<compile_context>
chip_gen: v7x
topology: tpu7x:2x2x1
jax: 0.10.0
libtpu: 0.0.40
codegen_flags: <defaults>
</compile_context>

<pallas_src>
import functools

import jax
import jax.numpy as jnp
from jax.experimental import pallas as pl
from jax.experimental.pallas import tpu as pltpu


# ---------------------------------------------------------------------------
# helpers
# ---------------------------------------------------------------------------
def _matT(a, b):
    """a @ b.T with f32 accumulation (no explicit transpose op)."""
    return jax.lax.dot_general(
        a, b, (((1,), (1,)), ((), ())), preferred_element_type=jnp.float32
    )


def _layernorm(h, gamma, beta, eps=1e-5):
    mu = jnp.mean(h, axis=-1, keepdims=True)
    d = h - mu
    var = jnp.mean(d * d, axis=-1, keepdims=True)
    return d * jax.lax.rsqrt(var + eps) * gamma + beta


def _pick_nb(n, l, row_target=1024):
    """Largest divisor of n such that nb * l <= row_target (>= 1)."""
    for d in range(n, 0, -1):
        if n % d == 0 and d * l <= row_target:
            return d
    return 1


def _pick_tm(m):
    """Prefer large row tiles (512-2048) for the merge/FFN kernel."""
    for tm in (2048, 1024, 512, 256, 128):
        if m % tm == 0:
            return tm
    return m


# ---------------------------------------------------------------------------
# Kernel 1: multi-head attention (Nb sequences per grid step)
# ---------------------------------------------------------------------------
def _mha_kernel(x_ref, wqkv_ref, bqkv_ref, wo_ref, bo_ref, *rest,
                n_heads, has_mask):
    if has_mask:
        mask_ref, o_ref, acc_ref = rest
    else:
        o_ref, acc_ref = rest

    nb, L, D = x_ref.shape
    hd = D // n_heads

    # Fused QKV projection on the flattened (nb*L, D) token matrix.
    # 1/sqrt(hd) scale is already folded into the Q rows of wqkv on the host.
    x2 = x_ref[...].reshape(nb * L, D)
    qkv = (_matT(x2, wqkv_ref[...]) + bqkv_ref[...]).reshape(nb, L, 3 * D)

    # Per-head attention, batched over the nb sequences via batched einsums.
    for h in range(n_heads):  # static unroll (n_heads is small)
        q0 = h * hd
        qh = qkv[:, :, q0:q0 + hd]                     # (nb, L, hd)
        kh = qkv[:, :, D + q0:D + q0 + hd]
        vh = qkv[:, :, 2 * D + q0:2 * D + q0 + hd]

        s = jnp.einsum("nqd,nkd->nqk", qh, kh,
                       preferred_element_type=jnp.float32)   # (nb, L, L)
        if has_mask:
            s = s + mask_ref[...]                      # (L, L) broadcasts over nb
        s = s - jnp.max(s, axis=-1, keepdims=True)
        p = jnp.exp(s)
        p = p * pl.reciprocal(jnp.sum(p, axis=-1, keepdims=True), approx=True)

        oh = jnp.einsum("nqk,nkd->nqd", p, vh,
                        preferred_element_type=jnp.float32)  # (nb, L, hd)
        acc_ref[:, :, q0:q0 + hd] = oh                 # static-slice store

    # Single out-projection over all heads / sequences at once.
    attn = acc_ref[...].reshape(nb * L, D)
    out = _matT(attn, wo_ref[...]) + bo_ref[...]
    o_ref[...] = out.reshape(nb, L, D).astype(o_ref.dtype)


def mha_pallas(x, wqkv, bqkv, wo, bo, n_heads, mask=None):
    """x: (N, L, D) -> (N, L, D). `mask` is an optional additive (L, L) mask."""
    N, L, D = x.shape
    nb = _pick_nb(N, L)
    has_mask = mask is not None

    in_specs = [
        pl.BlockSpec((nb, L, D), lambda n: (n, 0, 0)),
        pl.BlockSpec((3 * D, D), lambda n: (0, 0)),
        pl.BlockSpec((1, 3 * D), lambda n: (0, 0)),
        pl.BlockSpec((D, D), lambda n: (0, 0)),
        pl.BlockSpec((1, D), lambda n: (0, 0)),
    ]
    args = [x, wqkv, bqkv, wo, bo]
    if has_mask:
        in_specs.append(pl.BlockSpec((L, L), lambda n: (0, 0)))
        args.append(mask)

    return pl.pallas_call(
        functools.partial(_mha_kernel, n_heads=n_heads, has_mask=has_mask),
        out_shape=jax.ShapeDtypeStruct((N, L, D), jnp.float32),
        grid=(N // nb,),
        in_specs=in_specs,
        out_specs=pl.BlockSpec((nb, L, D), lambda n: (n, 0, 0)),
        scratch_shapes=[pltpu.VMEM((nb, L, D), jnp.float32)],
        compiler_params=pltpu.CompilerParams(
            dimension_semantics=("parallel",)),
    )(*args)


# ---------------------------------------------------------------------------
# Kernel 2: merge linear + residual + LN1 + FFN + residual + LN2
# ---------------------------------------------------------------------------
def _merge_ffn_kernel(x_ref, t_ref, s_ref,
                      wm1_ref, wm2_ref, bm_ref,
                      g1_ref, be1_ref,
                      w1_ref, b1_ref, w2_ref, b2_ref,
                      g2_ref, be2_ref, o_ref):
    x = x_ref[...]                                     # (tm, D)
    attn = (_matT(t_ref[...], wm1_ref[...])
            + _matT(s_ref[...], wm2_ref[...])
            + bm_ref[...])                             # merge(cat([temp, spat]))
    h = _layernorm(x + attn, g1_ref[...], be1_ref[...])
    f = jnp.maximum(_matT(h, w1_ref[...]) + b1_ref[...], 0.0)
    f = _matT(f, w2_ref[...]) + b2_ref[...]
    o_ref[...] = _layernorm(h + f, g2_ref[...], be2_ref[...]).astype(o_ref.dtype)


def merge_ffn_pallas(x2d, t2d, s2d, wm1, wm2, bm, g1, be1,
                     w1, b1, w2, b2, g2, be2):
    M, D = x2d.shape
    H = w1.shape[0]                                    # 4 * D
    tm = _pick_tm(M)
    rowspec = pl.BlockSpec((tm, D), lambda i: (i, 0))

    def const(shape):
        return pl.BlockSpec(shape, lambda i: (0,) * len(shape))

    # TODO(synk): if D stays at 32 in production, repack the output lane-dense
    #   ((M*D/128, 128)) in the wrapper to avoid 25%-lane masked stores.
    return pl.pallas_call(
        _merge_ffn_kernel,
        out_shape=jax.ShapeDtypeStruct((M, D), jnp.float32),
        grid=(M // tm,),
        in_specs=[rowspec, rowspec, rowspec,
                  const((D, D)), const((D, D)), const((1, D)),
                  const((1, D)), const((1, D)),
                  const((H, D)), const((1, H)), const((D, H)), const((1, D)),
                  const((1, D)), const((1, D))],
        out_specs=rowspec,
        compiler_params=pltpu.CompilerParams(
            dimension_semantics=("parallel",)),
    )(x2d, t2d, s2d, wm1, wm2, bm, g1, be1, w1, b1, w2, b2, g2, be2)


# ---------------------------------------------------------------------------
# Host-side parameter fusion (one-time constant transform)
# ---------------------------------------------------------------------------
def fuse_mha_params(wq, wk, wv, bq, bk, bv, wo, bo, n_heads):
    D = wq.shape[0]
    hd = D // n_heads
    scale = jnp.float32(1.0 / float(hd) ** 0.5)
    wqkv = jnp.concatenate([wq * scale, wk, wv], axis=0)      # (3D, D)
    bqkv = jnp.concatenate([bq * scale, bk, bv], axis=1)      # (1, 3D)
    return wqkv, bqkv, wo, bo


# ---------------------------------------------------------------------------
# Full decoder layer (Pallas) and a pure-JAX reference
# ---------------------------------------------------------------------------
def _causal_mask(T):
    m = jnp.triu(jnp.ones((T, T), dtype=bool), k=1)
    return jnp.where(m, jnp.float32(-1e9), jnp.float32(0.0))


def decoder_layer_pallas(x, p, n_heads):
    B, T, V, D = x.shape

    # temporal attention: torch (T, B*V, D)  ->  here (N=B*V, L=T, D)
    xt = x.transpose(0, 2, 1, 3).reshape(B * V, T, D)
    temp = mha_pallas(xt, *p["temporal_fused"], n_heads, mask=_causal_mask(T))
    temp = temp.reshape(B, V, T, D).transpose(0, 2, 1, 3)

    # "spatial" attention: torch (B*T, V, D) with seq=B*T, batch=V
    xs = x.reshape(B * T, V, D).transpose(1, 0, 2)             # (V, B*T, D)
    spat = mha_pallas(xs, *p["spatial_fused"], n_heads, mask=None)
    spat = spat.transpose(1, 0, 2).reshape(B, T, V, D)

    M = B * T * V
    out = merge_ffn_pallas(
        x.reshape(M, D), temp.reshape(M, D), spat.reshape(M, D),
        p["wm1"], p["wm2"], p["bm"],
        p["g1"], p["be1"], p["w1"], p["b1"], p["w2"], p["b2"],
        p["g2"], p["be2"])
    return out.reshape(B, T, V, D)


def _mha_ref(x_nld, wq, wk, wv, bq, bk, bv, wo, bo, mask, n_heads):
    N, L, D = x_nld.shape
    hd = D // n_heads
    q = (x_nld @ wq.T + bq).reshape(N, L, n_heads, hd).transpose(0, 2, 1, 3)
    k = (x_nld @ wk.T + bk).reshape(N, L, n_heads, hd).transpose(0, 2, 1, 3)
    v = (x_nld @ wv.T + bv).reshape(N, L, n_heads, hd).transpose(0, 2, 1, 3)
    s = jnp.einsum("nhld,nhmd->nhlm", q, k) / jnp.sqrt(jnp.float32(hd)) + mask
    p = jax.nn.softmax(s, axis=-1)
    o = jnp.einsum("nhlm,nhmd->nhld", p, v)
    o = o.transpose(0, 2, 1, 3).reshape(N, L, D)
    return o @ wo.T + bo


def decoder_layer_ref(x, p, n_heads):
    B, T, V, D = x.shape
    xt = x.transpose(0, 2, 1, 3).reshape(B * V, T, D)
    temp = _mha_ref(xt, *p["temporal"], _causal_mask(T), n_heads)
    temp = temp.reshape(B, V, T, D).transpose(0, 2, 1, 3)
    xs = x.reshape(B * T, V, D).transpose(1, 0, 2)
    spat = _mha_ref(xs, *p["spatial"],
                    jnp.zeros((B * T, B * T), jnp.float32), n_heads)
    spat = spat.transpose(1, 0, 2).reshape(B, T, V, D)
    attn = temp @ p["wm1"].T + spat @ p["wm2"].T + p["bm"]
    h = _layernorm(x + attn, p["g1"], p["be1"])
    f = jnp.maximum(h @ p["w1"].T + p["b1"], 0.0)
    f = f @ p["w2"].T + p["b2"]
    return _layernorm(h + f, p["g2"], p["be2"])


# ---------------------------------------------------------------------------
# main
# ---------------------------------------------------------------------------
if __name__ == "__main__":
    B, T, V, D, n_heads = 2, 8, 4, 32, 4

    key = jax.random.PRNGKey(0)
    ks = iter(jax.random.split(key, 32))

    def init(shape, scale=0.05):
        return (scale * jax.random.normal(next(ks), shape)).astype(jnp.float32)

    def mha_raw_params():
        # (wq, wk, wv) ~ in_proj_weight split, (D,D) each; out_proj (D,D)
        return (init((D, D)), init((D, D)), init((D, D)),
                init((1, D)), init((1, D)), init((1, D)),
                init((D, D)), init((1, D)))

    temporal_raw = mha_raw_params()
    spatial_raw = mha_raw_params()

    # merge: Linear(2D, D) split into the two D-column halves of its weight
    merge_w = init((D, 2 * D))
    params = {
        "temporal": temporal_raw,
        "spatial": spatial_raw,
        "temporal_fused": fuse_mha_params(*temporal_raw, n_heads),
        "spatial_fused": fuse_mha_params(*spatial_raw, n_heads),
        "wm1": merge_w[:, :D],
        "wm2": merge_w[:, D:],
        "bm": init((1, D)),
        "g1": jnp.ones((1, D), jnp.float32),
        "be1": jnp.zeros((1, D), jnp.float32),
        "w1": init((4 * D, D)),
        "b1": init((1, 4 * D)),
        "w2": init((D, 4 * D)),
        "b2": init((1, D)),
        "g2": jnp.ones((1, D), jnp.float32),
        "be2": jnp.zeros((1, D), jnp.float32),
    }

    x = jax.random.normal(next(ks), (B, T, V, D), dtype=jnp.float32)

    out = decoder_layer_pallas(x, params, n_heads)
    out = jax.block_until_ready(out)

    ref = decoder_layer_ref(x, params, n_heads)
    assert out.shape == (B, T, V, D)
    # slightly relaxed tolerance for pl.reciprocal(approx=True) in softmax
    assert bool(jnp.allclose(out, ref, atol=2e-3, rtol=2e-3)), "mismatch vs reference"

    print("KERNEL_OK")
</pallas_src>

<mosaic_0001>
module attributes {stable_mosaic.version = 11 : i64} {
  func.func @_mha_kernel(%arg0: i32, %arg1: memref<8x8x32xf32, #tpu.memory_space<vmem>>, %arg2: memref<96x32xf32, #tpu.memory_space<vmem>>, %arg3: memref<1x96xf32, #tpu.memory_space<vmem>>, %arg4: memref<32x32xf32, #tpu.memory_space<vmem>>, %arg5: memref<1x32xf32, #tpu.memory_space<vmem>>, %arg6: memref<8x8xf32, #tpu.memory_space<vmem>>, %arg7: memref<8x8x32xf32, #tpu.memory_space<vmem>>, %arg8: memref<8x8x32xf32, #tpu.memory_space<vmem>>) attributes {dimension_semantics = [#tpu.dimension_semantics<parallel>], iteration_bounds = array<i64: 1>, scalar_prefetch = 0 : i64, scratch_operands = 1 : i64, tpu.core_type = #tpu.core_type<tc>, window_params = [{transform_indices = @transform_0, window_bounds = array<i64: 8, 8, 32>}, {pipeline_mode = #tpu.pipeline_mode<synchronous>, transform_indices = @transform_1, window_bounds = array<i64: 96, 32>}, {pipeline_mode = #tpu.pipeline_mode<synchronous>, transform_indices = @transform_2, window_bounds = array<i64: 1, 96>}, {pipeline_mode = #tpu.pipeline_mode<synchronous>, transform_indices = @transform_3, window_bounds = array<i64: 32, 32>}, {pipeline_mode = #tpu.pipeline_mode<synchronous>, transform_indices = @transform_4, window_bounds = array<i64: 1, 32>}, {pipeline_mode = #tpu.pipeline_mode<synchronous>, transform_indices = @transform_5, window_bounds = array<i64: 8, 8>}, {transform_indices = @transform_6, window_bounds = array<i64: 8, 8, 32>}]} {
    %c0 = arith.constant 0 : index
    %c0_0 = arith.constant 0 : index
    %c0_1 = arith.constant 0 : index
    %0 = vector.load %arg1[%c0, %c0_0, %c0_1] : memref<8x8x32xf32, #tpu.memory_space<vmem>>, vector<8x8x32xf32>
    %1 = vector.shape_cast %0 : vector<8x8x32xf32> to vector<64x32xf32>
    %c0_2 = arith.constant 0 : index
    %c0_3 = arith.constant 0 : index
    %2 = vector.load %arg2[%c0_2, %c0_3] : memref<96x32xf32, #tpu.memory_space<vmem>>, vector<96x32xf32>
    %cst = arith.constant dense<0.000000e+00> : vector<64x96xf32>
    %3 = tpu.matmul %1, %2, %cst {dimension_numbers = #tpu.dot_dimension_numbers<[1], [1], [0], [0], [0, 0, 1, 0], [], []>} : vector<64x32xf32>, vector<96x32xf32>, vector<64x96xf32> -> vector<64x96xf32>
    %c0_4 = arith.constant 0 : index
    %c0_5 = arith.constant 0 : index
    %4 = vector.load %arg3[%c0_4, %c0_5] : memref<1x96xf32, #tpu.memory_space<vmem>>, vector<1x96xf32>
    %5 = vector.broadcast %4 : vector<1x96xf32> to vector<64x96xf32>
    %6 = arith.addf %3, %5 : vector<64x96xf32>
    %7 = vector.shape_cast %6 : vector<64x96xf32> to vector<8x8x96xf32>
    %8 = vector.extract_strided_slice %7 {offsets = [0, 0, 0], sizes = [8, 8, 8], strides = [1, 1, 1]} : vector<8x8x96xf32> to vector<8x8x8xf32>
    %9 = vector.extract_strided_slice %7 {offsets = [0, 0, 32], sizes = [8, 8, 8], strides = [1, 1, 1]} : vector<8x8x96xf32> to vector<8x8x8xf32>
    %10 = vector.extract_strided_slice %7 {offsets = [0, 0, 64], sizes = [8, 8, 8], strides = [1, 1, 1]} : vector<8x8x96xf32> to vector<8x8x8xf32>
    "tpu.trace_start"() <{level = 10 : i32, message = "nqd,nkd->nqk"}> : () -> ()
    %cst_6 = arith.constant dense<0.000000e+00> : vector<8x8x8xf32>
    %11 = tpu.matmul %8, %9, %cst_6 {dimension_numbers = #tpu.dot_dimension_numbers<[2], [2], [1], [1], [0, 0, 0, 1, 1, 1], [0], [0]>} : vector<8x8x8xf32>, vector<8x8x8xf32>, vector<8x8x8xf32> -> vector<8x8x8xf32>
    "tpu.trace_stop"() : () -> ()
    %c0_7 = arith.constant 0 : index
    %c0_8 = arith.constant 0 : index
    %12 = vector.load %arg6[%c0_7, %c0_8] : memref<8x8xf32, #tpu.memory_space<vmem>>, vector<8x8xf32>
    %13 = vector.shape_cast %12 : vector<8x8xf32> to vector<1x8x8xf32>
    %14 = vector.broadcast %13 : vector<1x8x8xf32> to vector<8x8x8xf32>
    %15 = arith.addf %11, %14 : vector<8x8x8xf32>
    %cst_9 = arith.constant dense<0xFF800000> : vector<8x8xf32>
    %16 = vector.multi_reduction <maximumf>, %15, %cst_9 [2] : vector<8x8x8xf32> to vector<8x8xf32>
    %17 = vector.shape_cast %16 : vector<8x8xf32> to vector<8x8x1xf32>
    %18 = vector.broadcast %17 : vector<8x8x1xf32> to vector<8x8x8xf32>
    %19 = arith.subf %15, %18 : vector<8x8x8xf32>
    %20 = math.exp %19 : vector<8x8x8xf32>
    %cst_10 = arith.constant dense<0.000000e+00> : vector<8x8xf32>
    %21 = vector.multi_reduction <add>, %20, %cst_10 [2] : vector<8x8x8xf32> to vector<8x8xf32>
    %22 = vector.shape_cast %21 : vector<8x8xf32> to vector<8x8x1xf32>
    %23 = tpu.reciprocal %22 {approx = true} : vector<8x8x1xf32> -> vector<8x8x1xf32>
    %24 = vector.broadcast %23 : vector<8x8x1xf32> to vector<8x8x8xf32>
    %25 = arith.mulf %20, %24 : vector<8x8x8xf32>
    "tpu.trace_start"() <{level = 10 : i32, message = "nqk,nkd->nqd"}> : () -> ()
    %cst_11 = arith.constant dense<0.000000e+00> : vector<8x8x8xf32>
    %26 = tpu.matmul %25, %10, %cst_11 {dimension_numbers = #tpu.dot_dimension_numbers<[2], [1], [1], [2], [0, 0, 0, 1, 1, 2], [0], [0]>} : vector<8x8x8xf32>, vector<8x8x8xf32>, vector<8x8x8xf32> -> vector<8x8x8xf32>
    "tpu.trace_stop"() : () -> ()
    %c0_12 = arith.constant 0 : index
    %c0_13 = arith.constant 0 : index
    %c0_14 = arith.constant 0 : index
    %27 = vector.load %arg8[%c0_12, %c0_13, %c0_14] : memref<8x8x32xf32, #tpu.memory_space<vmem>>, vector<8x8x8xf32>
    tpu.vector_store %arg8[%c0_12, %c0_13, %c0_14], %26 {strides = array<i32>} : memref<8x8x32xf32, #tpu.memory_space<vmem>>, vector<8x8x8xf32>,
    %28 = vector.extract_strided_slice %7 {offsets = [0, 0, 8], sizes = [8, 8, 8], strides = [1, 1, 1]} : vector<8x8x96xf32> to vector<8x8x8xf32>
    %29 = vector.extract_strided_slice %7 {offsets = [0, 0, 40], sizes = [8, 8, 8], strides = [1, 1, 1]} : vector<8x8x96xf32> to vector<8x8x8xf32>
    %30 = vector.extract_strided_slice %7 {offsets = [0, 0, 72], sizes = [8, 8, 8], strides = [1, 1, 1]} : vector<8x8x96xf32> to vector<8x8x8xf32>
    "tpu.trace_start"() <{level = 10 : i32, message = "nqd,nkd->nqk"}> : () -> ()
    %cst_15 = arith.constant dense<0.000000e+00> : vector<8x8x8xf32>
    %31 = tpu.matmul %28, %29, %cst_15 {dimension_numbers = #tpu.dot_dimension_numbers<[2], [2], [1], [1], [0, 0, 0, 1, 1, 1], [0], [0]>} : vector<8x8x8xf32>, vector<8x8x8xf32>, vector<8x8x8xf32> -> vector<8x8x8xf32>
    "tpu.trace_stop"() : () -> ()
    %c0_16 = arith.constant 0 : index
    %c0_17 = arith.constant 0 : index
    %32 = vector.load %arg6[%c0_16, %c0_17] : memref<8x8xf32, #tpu.memory_space<vmem>>, vector<8x8xf32>
    %33 = vector.shape_cast %32 : vector<8x8xf32> to vector<1x8x8xf32>
    %34 = vector.broadcast %33 : vector<1x8x8xf32> to vector<8x8x8xf32>
    %35 = arith.addf %31, %34 : vector<8x8x8xf32>
    %cst_18 = arith.constant dense<0xFF800000> : vector<8x8xf32>
    %36 = vector.multi_reduction <maximumf>, %35, %cst_18 [2] : vector<8x8x8xf32> to vector<8x8xf32>
    %37 = vector.shape_cast %36 : vector<8x8xf32> to vector<8x8x1xf32>
    %38 = vector.broadcast %37 : vector<8x8x1xf32> to vector<8x8x8xf32>
    %39 = arith.subf %35, %38 : vector<8x8x8xf32>
    %40 = math.exp %39 : vector<8x8x8xf32>
    %cst_19 = arith.constant dense<0.000000e+00> : vector<8x8xf32>
    %41 = vector.multi_reduction <add>, %40, %cst_19 [2] : vector<8x8x8xf32> to vector<8x8xf32>
    %42 = vector.shape_cast %41 : vector<8x8xf32> to vector<8x8x1xf32>
    %43 = tpu.reciprocal %42 {approx = true} : vector<8x8x1xf32> -> vector<8x8x1xf32>
    %44 = vector.broadcast %43 : vector<8x8x1xf32> to vector<8x8x8xf32>
    %45 = arith.mulf %40, %44 : vector<8x8x8xf32>
    "tpu.trace_start"() <{level = 10 : i32, message = "nqk,nkd->nqd"}> : () -> ()
    %cst_20 = arith.constant dense<0.000000e+00> : vector<8x8x8xf32>
    %46 = tpu.matmul %45, %30, %cst_20 {dimension_numbers = #tpu.dot_dimension_numbers<[2], [1], [1], [2], [0, 0, 0, 1, 1, 2], [0], [0]>} : vector<8x8x8xf32>, vector<8x8x8xf32>, vector<8x8x8xf32> -> vector<8x8x8xf32>
    "tpu.trace_stop"() : () -> ()
    %c0_21 = arith.constant 0 : index
    %c0_22 = arith.constant 0 : index
    %c8 = arith.constant 8 : index
    %47 = vector.load %arg8[%c0_21, %c0_22, %c8] : memref<8x8x32xf32, #tpu.memory_space<vmem>>, vector<8x8x8xf32>
    tpu.vector_store %arg8[%c0_21, %c0_22, %c8], %46 {strides = array<i32>} : memref<8x8x32xf32, #tpu.memory_space<vmem>>, vector<8x8x8xf32>,
    %48 = vector.extract_strided_slice %7 {offsets = [0, 0, 16], sizes = [8, 8, 8], strides = [1, 1, 1]} : vector<8x8x96xf32> to vector<8x8x8xf32>
    %49 = vector.extract_strided_slice %7 {offsets = [0, 0, 48], sizes = [8, 8, 8], strides = [1, 1, 1]} : vector<8x8x96xf32> to vector<8x8x8xf32>
    %50 = vector.extract_strided_slice %7 {offsets = [0, 0, 80], sizes = [8, 8, 8], strides = [1, 1, 1]} : vector<8x8x96xf32> to vector<8x8x8xf32>
    "tpu.trace_start"() <{level = 10 : i32, message = "nqd,nkd->nqk"}> : () -> ()
    %cst_23 = arith.constant dense<0.000000e+00> : vector<8x8x8xf32>
    %51 = tpu.matmul %48, %49, %cst_23 {dimension_numbers = #tpu.dot_dimension_numbers<[2], [2], [1], [1], [0, 0, 0, 1, 1, 1], [0], [0]>} : vector<8x8x8xf32>, vector<8x8x8xf32>, vector<8x8x8xf32> -> vector<8x8x8xf32>
    "tpu.trace_stop"() : () -> ()
    %c0_24 = arith.constant 0 : index
    %c0_25 = arith.constant 0 : index
    %52 = vector.load %arg6[%c0_24, %c0_25] : memref<8x8xf32, #tpu.memory_space<vmem>>, vector<8x8xf32>
    %53 = vector.shape_cast %52 : vector<8x8xf32> to vector<1x8x8xf32>
    %54 = vector.broadcast %53 : vector<1x8x8xf32> to vector<8x8x8xf32>
    %55 = arith.addf %51, %54 : vector<8x8x8xf32>
    %cst_26 = arith.constant dense<0xFF800000> : vector<8x8xf32>
    %56 = vector.multi_reduction <maximumf>, %55, %cst_26 [2] : vector<8x8x8xf32> to vector<8x8xf32>
    %57 = vector.shape_cast %56 : vector<8x8xf32> to vector<8x8x1xf32>
    %58 = vector.broadcast %57 : vector<8x8x1xf32> to vector<8x8x8xf32>
    %59 = arith.subf %55, %58 : vector<8x8x8xf32>
    %60 = math.exp %59 : vector<8x8x8xf32>
    %cst_27 = arith.constant dense<0.000000e+00> : vector<8x8xf32>
    %61 = vector.multi_reduction <add>, %60, %cst_27 [2] : vector<8x8x8xf32> to vector<8x8xf32>
    %62 = vector.shape_cast %61 : vector<8x8xf32> to vector<8x8x1xf32>
    %63 = tpu.reciprocal %62 {approx = true} : vector<8x8x1xf32> -> vector<8x8x1xf32>
    %64 = vector.broadcast %63 : vector<8x8x1xf32> to vector<8x8x8xf32>
    %65 = arith.mulf %60, %64 : vector<8x8x8xf32>
    "tpu.trace_start"() <{level = 10 : i32, message = "nqk,nkd->nqd"}> : () -> ()
    %cst_28 = arith.constant dense<0.000000e+00> : vector<8x8x8xf32>
    %66 = tpu.matmul %65, %50, %cst_28 {dimension_numbers = #tpu.dot_dimension_numbers<[2], [1], [1], [2], [0, 0, 0, 1, 1, 2], [0], [0]>} : vector<8x8x8xf32>, vector<8x8x8xf32>, vector<8x8x8xf32> -> vector<8x8x8xf32>
    "tpu.trace_stop"() : () -> ()
    %c0_29 = arith.constant 0 : index
    %c0_30 = arith.constant 0 : index
    %c16 = arith.constant 16 : index
    %67 = vector.load %arg8[%c0_29, %c0_30, %c16] : memref<8x8x32xf32, #tpu.memory_space<vmem>>, vector<8x8x8xf32>
    tpu.vector_store %arg8[%c0_29, %c0_30, %c16], %66 {strides = array<i32>} : memref<8x8x32xf32, #tpu.memory_space<vmem>>, vector<8x8x8xf32>,
    %68 = vector.extract_strided_slice %7 {offsets = [0, 0, 24], sizes = [8, 8, 8], strides = [1, 1, 1]} : vector<8x8x96xf32> to vector<8x8x8xf32>
    %69 = vector.extract_strided_slice %7 {offsets = [0, 0, 56], sizes = [8, 8, 8], strides = [1, 1, 1]} : vector<8x8x96xf32> to vector<8x8x8xf32>
    %70 = vector.extract_strided_slice %7 {offsets = [0, 0, 88], sizes = [8, 8, 8], strides = [1, 1, 1]} : vector<8x8x96xf32> to vector<8x8x8xf32>
    "tpu.trace_start"() <{level = 10 : i32, message = "nqd,nkd->nqk"}> : () -> ()
    %cst_31 = arith.constant dense<0.000000e+00> : vector<8x8x8xf32>
    %71 = tpu.matmul %68, %69, %cst_31 {dimension_numbers = #tpu.dot_dimension_numbers<[2], [2], [1], [1], [0, 0, 0, 1, 1, 1], [0], [0]>} : vector<8x8x8xf32>, vector<8x8x8xf32>, vector<8x8x8xf32> -> vector<8x8x8xf32>
    "tpu.trace_stop"() : () -> ()
    %c0_32 = arith.constant 0 : index
    %c0_33 = arith.constant 0 : index
    %72 = vector.load %arg6[%c0_32, %c0_33] : memref<8x8xf32, #tpu.memory_space<vmem>>, vector<8x8xf32>
    %73 = vector.shape_cast %72 : vector<8x8xf32> to vector<1x8x8xf32>
    %74 = vector.broadcast %73 : vector<1x8x8xf32> to vector<8x8x8xf32>
    %75 = arith.addf %71, %74 : vector<8x8x8xf32>
    %cst_34 = arith.constant dense<0xFF800000> : vector<8x8xf32>
    %76 = vector.multi_reduction <maximumf>, %75, %cst_34 [2] : vector<8x8x8xf32> to vector<8x8xf32>
    %77 = vector.shape_cast %76 : vector<8x8xf32> to vector<8x8x1xf32>
    %78 = vector.broadcast %77 : vector<8x8x1xf32> to vector<8x8x8xf32>
    %79 = arith.subf %75, %78 : vector<8x8x8xf32>
    %80 = math.exp %79 : vector<8x8x8xf32>
    %cst_35 = arith.constant dense<0.000000e+00> : vector<8x8xf32>
    %81 = vector.multi_reduction <add>, %80, %cst_35 [2] : vector<8x8x8xf32> to vector<8x8xf32>
    %82 = vector.shape_cast %81 : vector<8x8xf32> to vector<8x8x1xf32>
    %83 = tpu.reciprocal %82 {approx = true} : vector<8x8x1xf32> -> vector<8x8x1xf32>
    %84 = vector.broadcast %83 : vector<8x8x1xf32> to vector<8x8x8xf32>
    %85 = arith.mulf %80, %84 : vector<8x8x8xf32>
    "tpu.trace_start"() <{level = 10 : i32, message = "nqk,nkd->nqd"}> : () -> ()
    %cst_36 = arith.constant dense<0.000000e+00> : vector<8x8x8xf32>
    %86 = tpu.matmul %85, %70, %cst_36 {dimension_numbers = #tpu.dot_dimension_numbers<[2], [1], [1], [2], [0, 0, 0, 1, 1, 2], [0], [0]>} : vector<8x8x8xf32>, vector<8x8x8xf32>, vector<8x8x8xf32> -> vector<8x8x8xf32>
    "tpu.trace_stop"() : () -> ()
    %c0_37 = arith.constant 0 : index
    %c0_38 = arith.constant 0 : index
    %c24 = arith.constant 24 : index
    %87 = vector.load %arg8[%c0_37, %c0_38, %c24] : memref<8x8x32xf32, #tpu.memory_space<vmem>>, vector<8x8x8xf32>
    tpu.vector_store %arg8[%c0_37, %c0_38, %c24], %86 {strides = array<i32>} : memref<8x8x32xf32, #tpu.memory_space<vmem>>, vector<8x8x8xf32>,
    %c0_39 = arith.constant 0 : index
    %c0_40 = arith.constant 0 : index
    %c0_41 = arith.constant 0 : index
    %88 = vector.load %arg8[%c0_39, %c0_40, %c0_41] : memref<8x8x32xf32, #tpu.memory_space<vmem>>, vector<8x8x32xf32>
    %89 = vector.shape_cast %88 : vector<8x8x32xf32> to vector<64x32xf32>
    %c0_42 = arith.constant 0 : index
    %c0_43 = arith.constant 0 : index
    %90 = vector.load %arg4[%c0_42, %c0_43] : memref<32x32xf32, #tpu.memory_space<vmem>>, vector<32x32xf32>
    %cst_44 = arith.constant dense<0.000000e+00> : vector<64x32xf32>
    %91 = tpu.matmul %89, %90, %cst_44 {dimension_numbers = #tpu.dot_dimension_numbers<[1], [1], [0], [0], [0, 0, 1, 0], [], []>} : vector<64x32xf32>, vector<32x32xf32>, vector<64x32xf32> -> vector<64x32xf32>
    %c0_45 = arith.constant 0 : index
    %c0_46 = arith.constant 0 : index
    %92 = vector.load %arg5[%c0_45, %c0_46] : memref<1x32xf32, #tpu.memory_space<vmem>>, vector<1x32xf32>
    %93 = vector.broadcast %92 : vector<1x32xf32> to vector<64x32xf32>
    %94 = arith.addf %91, %93 : vector<64x32xf32>
    %95 = vector.shape_cast %94 : vector<64x32xf32> to vector<8x8x32xf32>
    %c0_47 = arith.constant 0 : index
    %c0_48 = arith.constant 0 : index
    %c0_49 = arith.constant 0 : index
    %96 = vector.load %arg7[%c0_47, %c0_48, %c0_49] : memref<8x8x32xf32, #tpu.memory_space<vmem>>, vector<8x8x32xf32>
    tpu.vector_store %arg7[%c0_47, %c0_48, %c0_49], %95 {strides = array<i32>} : memref<8x8x32xf32, #tpu.memory_space<vmem>>, vector<8x8x32xf32>,
    return
  }
  func.func @transform_0(%arg0: i32) -> (i32, i32, i32) {
    %c0_i32 = arith.constant 0 : i32
    %c0_i32_0 = arith.constant 0 : i32
    %c0_i32_1 = arith.constant 0 : i32
    return %arg0, %c0_i32, %c0_i32_0 : i32, i32, i32
  }
  func.func @transform_1(%arg0: i32) -> (i32, i32) {
    %c0_i32 = arith.constant 0 : i32
    %c0_i32_0 = arith.constant 0 : i32
    %c0_i32_1 = arith.constant 0 : i32
    return %c0_i32, %c0_i32_0 : i32, i32
  }
  func.func @transform_2(%arg0: i32) -> (i32, i32) {
    %c0_i32 = arith.constant 0 : i32
    %c0_i32_0 = arith.constant 0 : i32
    %c0_i32_1 = arith.constant 0 : i32
    return %c0_i32, %c0_i32_0 : i32, i32
  }
  func.func @transform_3(%arg0: i32) -> (i32, i32) {
    %c0_i32 = arith.constant 0 : i32
    %c0_i32_0 = arith.constant 0 : i32
    %c0_i32_1 = arith.constant 0 : i32
    return %c0_i32, %c0_i32_0 : i32, i32
  }
  func.func @transform_4(%arg0: i32) -> (i32, i32) {
    %c0_i32 = arith.constant 0 : i32
    %c0_i32_0 = arith.constant 0 : i32
    %c0_i32_1 = arith.constant 0 : i32
    return %c0_i32, %c0_i32_0 : i32, i32
  }
  func.func @transform_5(%arg0: i32) -> (i32, i32) {
    %c0_i32 = arith.constant 0 : i32
    %c0_i32_0 = arith.constant 0 : i32
    %c0_i32_1 = arith.constant 0 : i32
    return %c0_i32, %c0_i32_0 : i32, i32
  }
  func.func @transform_6(%arg0: i32) -> (i32, i32, i32) {
    %c0_i32 = arith.constant 0 : i32
    %c0_i32_0 = arith.constant 0 : i32
    %c0_i32_1 = arith.constant 0 : i32
    return %arg0, %c0_i32, %c0_i32_0 : i32, i32, i32
  }
}

</mosaic_0001>

<bundles_post_ra>
// kernel: tpu_custom_call.1
= control target key start
LH: loop header
LB: loop body
LE: loop exit
PB: predicated region body
PF: predicated region fallthrough
CT: control target
= control target key end

     0   :  { %vm51_vm0 = vcmask 261120   ;;  %s7793_s0 = inlined_call_operand.vmem [shape: f32[8,8,32], index: 0, kind: input, shape index: {}]   ;;  %s7794_s1 = inlined_call_operand.vmem [shape: f32[96,32], index: 1, kind: input, shape index: {}]   ;;  %s7795_s2 = inlined_call_operand.vmem [shape: f32[1,96], index: 2, kind: input, shape index: {}]   ;;  %s7796_s3 = inlined_call_operand.vmem [shape: f32[32,32], index: 3, kind: input, shape index: {}]   ;;  %s7797_s4 = inlined_call_operand.vmem [shape: f32[1,32], index: 4, kind: input, shape index: {}]   ;;  %s7798_s5 = inlined_call_operand.vmem [shape: f32[8,8], index: 5, kind: input, shape index: {}]   ;;  %s7799_s6 = inlined_call_operand.hbm [shape: f32[8,8,32], index: 6, kind: output, shape index: {}]  }
   0x1   :  { %v32_v0 = vld [vmem:[%s7794_s1] sm:$0xff]  ;;  %v33_v1 = vld [vmem:[%s7794_s1 + $0x8] sm:$0xff]  ;;  %v34_v2 = vld [vmem:[%s7794_s1 + $0x10] sm:$0xff] }
   0x2   :  { %v6475_v3 = vpack.c.bf16 %v33_v1, %v32_v0  ;;  %vm6758_vm1 = vmpackc.low %vm51_vm0, %vm51_vm0  ;;  %v35_v5 = vld [vmem:[%s7794_s1 + $0x18] sm:$0xff]  ;;  %v24_v7 = vld [vmem:[%s7793_s0] sm:$0xff] }
   0x3   :  { %v6481_v6 = vpack.c.bf16 %v35_v5, %v34_v2  ;;  %6123 = vmatprep.mubr.msk.f32.mxu0 %vm51_vm0, %v24_v7  ;;  %v36_v8 = vld [vmem:[%s7794_s1 + $0x20] sm:$0xff]  ;;  %v37_v9 = vld [vmem:[%s7794_s1 + $0x28] sm:$0xff] }
   0x4   :  { %6477 = vmatprep.subr.msk.bf16.mxu0 %vm6758_vm1, %v6475_v3 }
   0x5   :  { %6480 = vmatpush3.bf16.xpose.msk.msra.mxu0 %vm6758_vm1, %v6475_v3 }
   0x6   :  { %6483 = vmatprep.subr.msk.bf16.mxu0 %vm6758_vm1, %v6481_v6 }
   0x7   :  { %11 = vsyncpa [#allocation4], 0  ;;  %v6487_v10 = vpack.c.bf16 %v37_v9, %v36_v8  ;;  %v38_v11 = vld [vmem:[%s7794_s1 + $0x30] sm:$0xff]  ;;  %v39_v12 = vld [vmem:[%s7794_s1 + $0x38] sm:$0xff]  ;;  %v6694_v27 = vmov 0.0   ;;  %vm6695_vm2 = vmmov 0  }
   0x8   :  { %v6493_v13 = vpack.c.bf16 %v39_v12, %v38_v11  ;;  %v40_v14 = vld [vmem:[%s7794_s1 + $0x40] sm:$0xff]  ;;  %v41_v15 = vld [vmem:[%s7794_s1 + $0x48] sm:$0xff]  ;;  %v42_v17 = vld [vmem:[%s7794_s1 + $0x50] sm:$0xff]  ;;  %6150 = vmatprep.subr.mxu1 %v6694_v27  ;;  %6152 = vmatprep.mubr.msk.f32.mxu1 %vm6695_vm2, %v6694_v27  ;;  %vm221_vm3 = vcmask 64512   ;;  %s6698_s16 = smov 88   ;;  %s6699_s17 = smov 120  }
   0x9   :  { %v6499_v16 = vpack.c.bf16 %v41_v15, %v40_v14  ;;  %v43_v18 = vld [vmem:[%s7794_s1 + $0x58] sm:$0xff]  ;;  %v25_v20 = vld [vmem:[%s7793_s0 + $0x8] sm:$0xff]  ;;  %v26_v21 = vld [vmem:[%s7793_s0 + $0x10] sm:$0xff]  ;;  %s6700_s18 = smov 56   ;;  %s6701_s19 = smov 80   ;;  %vm2892_vm4 = vcmask 130112  }
   0xa   :  { %v6505_v19 = vpack.c.bf16 %v43_v18, %v42_v17  ;;  %v27_v22 = vld [vmem:[%s7793_s0 + $0x18] sm:$0xff]  ;;  %v28_v23 = vld [vmem:[%s7793_s0 + $0x20] sm:$0xff]  ;;  %v29_v24 = vld [vmem:[%s7793_s0 + $0x28] sm:$0xff]  ;;  %s6702_s20 = smov 112   ;;  %s6703_s21 = smov 48   ;;  %vm4254_vm5 = vcmask 195712  }
   0xb   :  { %v30_v25 = vld [vmem:[%s7793_s0 + $0x30] sm:$0xff]  ;;  %v31_v26 = vld [vmem:[%s7793_s0 + $0x38] sm:$0xff]  ;;  %v5809_v28 = vld [vmem:[%s7795_s2] ss:$0 sm:$0xff]  ;;  %s6696_s0 = smov 96   ;;  %s6697_s2 = smov 64  }
   0xc   :  { %v6945_v58 = vld [vmem:[%s7798_s5] sm:$0xff]  ;;  %s6704_s22 = smov 72   ;;  %s6705_s23 = smov 104   ;;  %vm5616_vm6 = vcmask 261312  }
   0xd   :  { %6486 = vmatpush3.bf16.xpose.msk.msra.mxu0 %vm6758_vm1, %v6481_v6  ;;  %s6707_s27 = smov 8   ;;  %s6708_s28 = smov 16  }
   0xe   :  { %6489 = vmatprep.subr.msk.bf16.mxu0 %vm6758_vm1, %v6487_v10  ;;  %s6709_s9 = smov 24  }
  0x15   :  { %6492 = vmatpush3.bf16.xpose.msk.msra.mxu0 %vm6758_vm1, %v6487_v10 }
  0x16   :  { %6495 = vmatprep.subr.msk.bf16.mxu0 %vm6758_vm1, %v6493_v13 }
  0x1d   :  { %6498 = vmatpush3.bf16.xpose.msk.msra.mxu0 %vm6758_vm1, %v6493_v13 }
  0x1e   :  { %6501 = vmatprep.subr.msk.bf16.mxu0 %vm6758_vm1, %v6499_v16 }
  0x25   :  { %6504 = vmatpush3.bf16.xpose.msk.msra.mxu0 %vm6758_vm1, %v6499_v16 }
  0x26   :  { %6507 = vmatprep.subr.msk.bf16.mxu0 %vm6758_vm1, %v6505_v19 }
  0x2d   :  { %6510 = vmatpush3.bf16.xpose.msk.msra.mxu0 %vm6758_vm1, %v6505_v19 }
  0x2e   :  { %6135 = vmatprep.subr.mxu0 %v6694_v27 }
  0x34   :  { %6124 = vmatmul.mubr.msk.f32.vlgmr.msra.gmra.mrb[0].mxu0 %vm51_vm0, %v25_v20 }
  0x35   :  { %6126 = vmatprep.mubr.msk.f32.mxu0 %vm51_vm0, %v26_v21 }
  0x38   :  { %6127 = vmatmul.mubr.msk.f32.gmra.mrb[2].mxu0 %vm51_vm0, %v27_v22 }
  0x39   :  { %6129 = vmatprep.mubr.msk.f32.mxu0 %vm51_vm0, %v28_v23 }
  0x3c   :  { %6130 = vmatmul.mubr.msk.f32.gmra.mrb[4].mxu0 %vm51_vm0, %v29_v24 }
  0x3d   :  { %6132 = vmatprep.mubr.msk.f32.mxu0 %vm51_vm0, %v30_v25 }
  0x40   :  { %6133 = vmatmul.mubr.msk.f32.gmra.mrb[6].mxu0 %vm51_vm0, %v31_v26 }
  0x41   :  { %6137 = vmatprep.mubr.msk.f32.mxu0 %vm6695_vm2, %v6694_v27 }
 0x107   :  { %v6125_v29 = vpop.f32.mrb[0].mxu0 }
 0x108   :  { %v178_v30 = vpop.f32.mrb[1].mxu0  ;;  %v6857_v34 = vadd.f32 %v6125_v29, %v5809_v28 }
 0x109   :  { %v6854_v31 = vadd.f32 %v5809_v28, %v178_v30 }
 0x10b   :  { %v6128_v32 = vpop.f32.mrb[2].mxu0  ;;  %219 = vrot.lane.b32.xlu0 %v6854_v31, %s6696_s0 }
 0x10c   :  { %v188_v33 = vpop.f32.mrb[3].mxu0  ;;  %v6861_v36 = vadd.f32 %v6128_v32, %v5809_v28 }
 0x10d   :  { %v6859_v35 = vadd.f32 %v5809_v28, %v188_v33 }
 0x10f   :  { %v6131_v37 = vpop.f32.mrb[4].mxu0  ;;  %374 = vrot.lane.b32.xlu1 %v6859_v35, %s6696_s0  ;;  %297 = vrot.lane.b32.xlu0 %v6857_v34, %s6696_s0 }
 0x110   :  { %v198_v38 = vpop.f32.mrb[5].mxu0  ;;  %v6867_v40 = vadd.f32 %v6131_v37, %v5809_v28 }
 0x111   :  { %v6865_v39 = vadd.f32 %v5809_v28, %v198_v38 }
 0x113   :  { %v6134_v41 = vpop.f32.mrb[6].mxu0  ;;  %451 = vrot.lane.b32.xlu1 %v6861_v36, %s6696_s0  ;;  %528 = vrot.lane.b32.xlu0 %v6865_v39, %s6696_s0 }
 0x114   :  { %v208_v42 = vpop.f32.mrb[7].mxu0  ;;  %v6873_v44 = vadd.f32 %v6134_v41, %v5809_v28 }
 0x115   :  { %v6871_v43 = vadd.f32 %v5809_v28, %v208_v42 }
 0x117   :  { %605 = vrot.lane.b32.xlu1 %v6867_v40, %s6696_s0  ;;  %682 = vrot.lane.b32.xlu0 %v6871_v43, %s6696_s0 }
 0x11b   :  { %759 = vrot.lane.b32.xlu1 %v6873_v44, %s6696_s0  ;;  %923 = vrot.lane.b32.xlu0 %v6854_v31, %s6697_s2 }
 0x11f   :  { %999 = vrot.lane.b32.xlu1 %v6857_v34, %s6697_s2  ;;  %1075 = vrot.lane.b32.xlu0 %v6859_v35, %s6697_s2 }
 0x123   :  { %1151 = vrot.lane.b32.xlu1 %v6861_v36, %s6697_s2  ;;  %1227 = vrot.lane.b32.xlu0 %v6865_v39, %s6697_s2 }
 0x127   :  { %1303 = vrot.lane.b32.xlu1 %v6867_v40, %s6697_s2  ;;  %1379 = vrot.lane.b32.xlu0 %v6871_v43, %s6697_s2 }
 0x12b   :  { %1455 = vrot.lane.b32.xlu1 %v6873_v44, %s6697_s2 }
 0x17d   :  { %v220_v45 = vpop.permute.xlu0 %219 }
 0x17e   :  { %6136 = vmatpush3.xpose.msk.msra.mxu0 %vm221_vm3, %v220_v45 }
 0x17f   :  { %6140 = vmatprep.subr.mxu0 %v6694_v27 }
 0x181   :  { %v375_v46 = vpop.permute.xlu1 %374  ;;  %6138 = vmatmul.mubr.msk.f32.vlgmr.msra.gmra.mrb[8].mxu0 %vm221_vm3, %v6854_v31  ;;  %v298_v47 = vpop.permute.xlu0 %297 }
 0x182   :  { %6141 = vmatpush3.xpose.msk.msra.mxu0 %vm221_vm3, %v298_v47  ;;  %6142 = vmatprep.mubr.msk.f32.mxu0 %vm6695_vm2, %v6694_v27 }
 0x183   :  { %6145 = vmatprep.subr.mxu0 %v6694_v27 }
 0x185   :  { %v452_v48 = vpop.permute.xlu1 %451  ;;  %6143 = vmatmul.mubr.msk.f32.vlgmr.msra.gmra.mrb[10].mxu0 %vm221_vm3, %v6857_v34  ;;  %v529_v49 = vpop.permute.xlu0 %528 }
 0x186   :  { %6146 = vmatpush3.xpose.msk.msra.mxu0 %vm221_vm3, %v375_v46  ;;  %6151 = vmatpush3.xpose.msk.msra.mxu1 %vm221_vm3, %v452_v48 }
 0x187   :  { %6147 = vmatprep.mubr.msk.f32.mxu0 %vm6695_vm2, %v6694_v27  ;;  %6155 = vmatprep.subr.mxu1 %v6694_v27 }
 0x188   :  { %6210 = vmatprep.subr.mxu0 %v6694_v27 }
 0x189   :  { %6153 = vmatmul.mubr.msk.f32.vlgmr.msra.gmra.mrb[0].mxu1 %vm221_vm3, %v6861_v36  ;;  %v606_v50 = vpop.permute.xlu1 %605  ;;  %6148 = vmatmul.mubr.msk.f32.vlgmr.msra.gmra.mrb[12].mxu0 %vm221_vm3, %v6859_v35  ;;  %v683_v52 = vpop.permute.xlu0 %682 }
 0x18a   :  { %6156 = vmatpush3.xpose.msk.msra.mxu1 %vm221_vm3, %v529_v49  ;;  %6157 = vmatprep.mubr.msk.f32.mxu1 %vm6695_vm2, %v6694_v27 }
 0x18b   :  { %6160 = vmatprep.subr.mxu1 %v6694_v27  ;;  %6212 = vmatprep.mubr.msk.f32.mxu0 %vm6695_vm2, %v6694_v27 }
 0x18d   :  { %v760_v51 = vpop.permute.xlu1 %759  ;;  %6158 = vmatmul.mubr.msk.f32.vlgmr.msra.gmra.mrb[2].mxu1 %vm221_vm3, %v6865_v39  ;;  %v924_v55 = vpop.permute.xlu0 %923 }
 0x18e   :  { %6161 = vmatpush3.xpose.msk.msra.mxu1 %vm221_vm3, %v606_v50  ;;  %6162 = vmatprep.mubr.msk.f32.mxu1 %vm6695_vm2, %v6694_v27 }
 0x18f   :  { %6165 = vmatprep.subr.mxu1 %v6694_v27 }
 0x191   :  { %v6918_v53 = vpop.permute.xlu1 %999  ;;  %6163 = vmatmul.mubr.msk.f32.vlgmr.msra.gmra.mrb[4].mxu1 %vm221_vm3, %v6867_v40  ;;  %v6973_v29 = vpop.permute.xlu0 %1075 }
 0x192   :  { %6166 = vmatpush3.xpose.msk.msra.mxu1 %vm221_vm3, %v683_v52  ;;  %6167 = vmatprep.mubr.msk.f32.mxu1 %vm6695_vm2, %v6694_v27 }
 0x193   :  { %6170 = vmatprep.subr.mxu1 %v6694_v27 }
 0x195   :  { %6168 = vmatmul.mubr.msk.f32.vlgmr.msra.gmra.mrb[6].mxu1 %vm221_vm3, %v6871_v43  ;;  %v6928_v54 = vpop.permute.xlu1 %1151  ;;  %v6975_v30 = vpop.permute.xlu0 %1227 }
 0x196   :  { %6171 = vmatpush3.xpose.msk.msra.mxu1 %vm221_vm3, %v760_v51  ;;  %6172 = vmatprep.mubr.msk.f32.mxu1 %vm6695_vm2, %v6694_v27 }
 0x197   :  { %6175 = vmatprep.subr.mxu1 %v6694_v27 }
 0x199   :  { %6173 = vmatmul.mubr.msk.f32.vlgmr.msra.gmra.mrb[8].mxu1 %vm221_vm3, %v6873_v44  ;;  %v6936_v56 = vpop.permute.xlu1 %1303  ;;  %v6977_v32 = vpop.permute.xlu0 %1379 }
 0x19a   :  { %6176 = vmatpush3.msra.mxu1 %v924_v55  ;;  %6177 = vmatprep.mubr.msk.f32.mxu1 %vm6695_vm2, %v6694_v27 }
 0x19b   :  { %6180 = vmatprep.subr.mxu1 %v6694_v27 }
 0x19d   :  { %v1456_v57 = vpop.permute.xlu1 %1455 }
 0x19e   :  { %6211 = vmatpush3.msra.mxu0 %v1456_v57 }
 0x19f   :  { %6220 = vmatprep.subr.mxu0 %v6694_v27 }
 0x254   :  { %v292_v59 = vpop.f32.mrb[8].mxu0 }
 0x255   :  { %v293_v60 = vadd.f32 %v292_v59, %v6945_v58  ;;  %v6139_v61 = vpop.f32.mrb[9].mxu0 }
 0x257   :  { %v835_v62 = vsel %vm221_vm3, %v293_v60, -inf }
 0x258   :  { %836 = vmax.xlane.f32.xlu0 %v835_v62  ;;  %v369_v63 = vpop.f32.mrb[10].mxu0 }
 0x259   :  { %v370_v0 = vadd.f32 %v369_v63, %v6945_v58  ;;  %v6144_v1 = vpop.f32.mrb[11].mxu0 }
 0x25b   :  { %v838_v2 = vsel %vm221_vm3, %v370_v0, -inf }
 0x25c   :  { %v523_v3 = vpop.f32.mrb[0].mxu1  ;;  %839 = vmax.xlane.f32.xlu1 %v838_v2  ;;  %v446_v5 = vpop.f32.mrb[12].mxu0 }
 0x25d   :  { %v524_v6 = vadd.f32 %v523_v3, %v6945_v58  ;;  %v6149_v7 = vpop.f32.mrb[13].mxu0  ;;  %v6154_v8 = vpop.f32.mrb[1].mxu1  ;;  %v447_v9 = vadd.f32 %v446_v5, %v6945_v58 }
 0x25f   :  { %v844_v10 = vsel %vm221_vm3, %v524_v6, -inf  ;;  %v841_v14 = vsel %vm221_vm3, %v447_v9, -inf }
 0x260   :  { %845 = vmax.xlane.f32.xlu0 %v844_v10  ;;  %v600_v11 = vpop.f32.mrb[2].mxu1 }
 0x261   :  { %v601_v12 = vadd.f32 %v600_v11, %v6945_v58  ;;  %v6159_v13 = vpop.f32.mrb[3].mxu1 }
 0x263   :  { %v847_v15 = vsel %vm221_vm3, %v601_v12, -inf }
 0x264   :  { %842 = vmax.xlane.f32.xlu0 %v841_v14  ;;  %848 = vmax.xlane.f32.xlu1 %v847_v15  ;;  %v677_v16 = vpop.f32.mrb[4].mxu1 }
 0x265   :  { %v678_v17 = vadd.f32 %v677_v16, %v6945_v58  ;;  %v6164_v18 = vpop.f32.mrb[5].mxu1 }
 0x267   :  { %v850_v19 = vsel %vm221_vm3, %v678_v17, -inf }
 0x268   :  { %851 = vmax.xlane.f32.xlu0 %v850_v19  ;;  %v754_v20 = vpop.f32.mrb[6].mxu1 }
 0x269   :  { %v6960_v21 = vadd.f32 %v754_v20, %v6945_v58  ;;  %v6169_v22 = vpop.f32.mrb[7].mxu1 }
 0x26b   :  { %v853_v23 = vsel %vm221_vm3, %v6960_v21, -inf }
 0x26c   :  { %854 = vmax.xlane.f32.xlu1 %v853_v23  ;;  %v831_v24 = vpop.f32.mrb[8].mxu1 }
 0x26d   :  { %v6965_v25 = vadd.f32 %v831_v24, %v6945_v58  ;;  %v6174_v26 = vpop.f32.mrb[9].mxu1 }
 0x26f   :  { %v856_v28 = vsel %vm221_vm3, %v6965_v25, -inf }
 0x270   :  { %857 = vmax.xlane.f32.xlu0 %v856_v28 }
 0x27d   :  { %1620 = vrot.lane.b32.xlu1 %v6857_v34, %s6698_s16 }
 0x286   :  { %1542 = vrot.lane.b32.xlu0 %v6854_v31, %s6698_s16 }
 0x2e5   :  { %v837_v33 = vpop.xlane.xlu0 %836 }
 0x2e6   :  { %v859_v37 = vsub.f32 %v293_v60, %v837_v33 }
 0x2e8   :  { %v867_v38 = vmul.f32 1.442695, %v859_v37 }
 0x2e9   :  { %v840_v41 = vpop.xlane.xlu1 %839 }
 0x2ea   :  { %6541 = vpow2.f32 %v867_v38  ;;  %v860_v42 = vsub.f32 %v370_v0, %v840_v41 }
 0x2ec   :  { %v869_v47 = vmul.f32 1.442695, %v860_v42 }
 0x2ed   :  { %v846_v45 = vpop.xlane.xlu0 %845 }
 0x2ee   :  { %v862_v46 = vsub.f32 %v524_v6, %v846_v45 }
 0x2f0   :  { %v873_v48 = vmul.f32 1.442695, %v862_v46 }
 0x2f1   :  { %v843_v59 = vpop.xlane.xlu0 %842  ;;  %v849_v61 = vpop.xlane.xlu1 %848 }
 0x2f2   :  { %6543 = vpow2.f32 %v873_v48  ;;  %v861_v60 = vsub.f32 %v447_v9, %v843_v59  ;;  %v863_v62 = vsub.f32 %v601_v12, %v849_v61 }
 0x2f3   :  { %6545 = vpow2.f32 %v869_v47 }
 0x2f4   :  { %v6979_v49 = vpop.eup %6541  ;;  %v871_v63 = vmul.f32 1.442695, %v861_v60  ;;  %v875_v0 = vmul.f32 1.442695, %v863_v62 }
 0x2f5   :  { %v883_v50 = vsel %vm221_vm3, %v6979_v49, 0.0  ;;  %v852_v1 = vpop.xlane.xlu0 %851 }
 0x2f6   :  { %884 = vadd.xlane.f32.xlu1 %v883_v50  ;;  %6547 = vpow2.f32 %v871_v63  ;;  %v864_v2 = vsub.f32 %v678_v17, %v852_v1 }
 0x2f7   :  { %6549 = vpow2.f32 %v875_v0 }
 0x2f8   :  { %v877_v3 = vmul.f32 1.442695, %v864_v2 }
 0x2f9   :  { %v855_v11 = vpop.xlane.xlu1 %854 }
 0x2fa   :  { %6551 = vpow2.f32 %v877_v3  ;;  %v865_v12 = vsub.f32 %v6960_v21, %v855_v11 }
 0x2fc   :  { %v6983_v51 = vpop.eup %6543  ;;  %v879_v14 = vmul.f32 1.442695, %v865_v12 }
 0x2fd   :  { %v892_v52 = vsel %vm221_vm3, %v6983_v51, 0.0  ;;  %v6987_v55 = vpop.eup %6545  ;;  %v858_v13 = vpop.xlane.xlu0 %857 }
 0x2fe   :  { %893 = vadd.xlane.f32.xlu0 %v892_v52  ;;  %v886_v57 = vsel %vm221_vm3, %v6987_v55, 0.0  ;;  %v866_v15 = vsub.f32 %v6965_v25, %v858_v13  ;;  %6553 = vpow2.f32 %v879_v14  ;;  %v7035_v21 = vpop.permute.xlu1 %1620 }
 0x300   :  { %v6995_v5 = vpop.eup %6547  ;;  %v881_v16 = vmul.f32 1.442695, %v866_v15 }
 0x301   :  { %v889_v6 = vsel %vm221_vm3, %v6995_v5, 0.0  ;;  %v6999_v7 = vpop.eup %6549  ;;  %v7041_v23 = vpop.permute.xlu0 %1542 }
 0x302   :  { %887 = vadd.xlane.f32.xlu0 %v886_v57  ;;  %v895_v8 = vsel %vm221_vm3, %v6999_v7, 0.0  ;;  %6555 = vpow2.f32 %v881_v16 }
 0x304   :  { %v7003_v9 = vpop.eup %6551 }
 0x305   :  { %v898_v10 = vsel %vm221_vm3, %v7003_v9, 0.0 }
 0x307   :  { %1618 = vrot.lane.b32.xlu1 %v6857_v34, %s6699_s17 }
 0x308   :  { %v7025_v17 = vpop.eup %6553 }
 0x309   :  { %v901_v18 = vsel %vm221_vm3, %v7025_v17, 0.0 }
 0x30c   :  { %v7029_v19 = vpop.eup %6555 }
 0x30d   :  { %v904_v20 = vsel %vm221_vm3, %v7029_v19, 0.0 }
 0x318   :  { %1540 = vrot.lane.b32.xlu0 %v6854_v31, %s6699_s17 }
 0x32b   :  { %890 = vadd.xlane.f32.xlu1 %v889_v6 }
 0x32f   :  { %896 = vadd.xlane.f32.xlu1 %v895_v8 }
 0x337   :  { %899 = vadd.xlane.f32.xlu0 %v898_v10 }
 0x340   :  { %1776 = vrot.lane.b32.xlu1 %v6861_v36, %s6698_s16 }
 0x344   :  { %1774 = vrot.lane.b32.xlu1 %v6861_v36, %s6699_s17 }
 0x34d   :  { %1698 = vrot.lane.b32.xlu0 %v6859_v35, %s6698_s16 }
 0x351   :  { %1696 = vrot.lane.b32.xlu0 %v6859_v35, %s6699_s17 }
 0x355   :  { %1854 = vrot.lane.b32.xlu0 %v6865_v39, %s6698_s16 }
 0x359   :  { %1852 = vrot.lane.b32.xlu0 %v6865_v39, %s6699_s17 }
 0x35d   :  { %2010 = vrot.lane.b32.xlu0 %v6871_v43, %s6698_s16 }
 0x361   :  { %2008 = vrot.lane.b32.xlu0 %v6871_v43, %s6699_s17 }
 0x368   :  { %902 = vadd.xlane.f32.xlu1 %v901_v18 }
 0x36c   :  { %905 = vadd.xlane.f32.xlu1 %v904_v20 }
 0x37d   :  { %1932 = vrot.lane.b32.xlu1 %v6867_v40, %s6698_s16 }
 0x381   :  { %1930 = vrot.lane.b32.xlu1 %v6867_v40, %s6699_s17 }
 0x383   :  { %v885_v22 = vpop.xlane.xlu1 %884 }
 0x384   :  { %6557 = vrcp.f32 %v885_v22 }
 0x385   :  { %2088 = vrot.lane.b32.xlu1 %v6873_v44, %s6698_s16 }
 0x387   :  { %v1619_v38 = vpop.permute.xlu1 %1618 }
 0x389   :  { %2086 = vrot.lane.b32.xlu1 %v6873_v44, %s6699_s17 }
 0x38b   :  { %v894_v24 = vpop.xlane.xlu0 %893 }
 0x38e   :  { %v6558_v25 = vpop.eup %6557 }
 0x38f   :  { %v888_v26 = vpop.xlane.xlu0 %887  ;;  %v915_v28 = vmul.f32 %v6558_v25, %v6979_v49 }
 0x390   :  { %6559 = vrcp.f32 %v888_v26 }
 0x391   :  { %6178 = vmatmul.mubr.msk.f32.vlgmr.msra.gmra.mrb[10].mxu1 %vm221_vm3, %v915_v28 }
 0x392   :  { %6181 = vmatpush3.msra.mxu1 %v6918_v53  ;;  %6182 = vmatprep.mubr.msk.f32.mxu1 %vm6695_vm2, %v6694_v27 }
 0x393   :  { %6185 = vmatprep.subr.mxu1 %v6694_v27  ;;  %v1541_v42 = vpop.permute.xlu0 %1540 }
 0x39a   :  { %v6560_v33 = vpop.eup %6559 }
 0x39b   :  { %v916_v37 = vmul.f32 %v6560_v33, %v6987_v55 }
 0x39d   :  { %6183 = vmatmul.mubr.msk.f32.vlgmr.msra.gmra.mrb[12].mxu1 %vm221_vm3, %v916_v37 }
 0x39e   :  { %6186 = vmatpush3.msra.mxu1 %v6973_v29  ;;  %6187 = vmatprep.mubr.msk.f32.mxu1 %vm6695_vm2, %v6694_v27 }
 0x39f   :  { %6190 = vmatprep.subr.mxu1 %v6694_v27 }
 0x3b8   :  { %v891_v41 = vpop.xlane.xlu1 %890 }
 0x3b9   :  { %6561 = vrcp.f32 %v891_v41 }
 0x3ba   :  { %6563 = vrcp.f32 %v894_v24 }
 0x3bc   :  { %v897_v53 = vpop.xlane.xlu1 %896 }
 0x3bd   :  { %6565 = vrcp.f32 %v897_v53 }
 0x3c3   :  { %v6562_v45 = vpop.eup %6561 }
 0x3c4   :  { %v900_v46 = vpop.xlane.xlu0 %899  ;;  %v917_v47 = vmul.f32 %v6562_v45, %v6995_v5  ;;  %v6564_v48 = vpop.eup %6563 }
 0x3c5   :  { %6567 = vrcp.f32 %v900_v46  ;;  %v918_v29 = vmul.f32 %v6564_v48, %v6983_v51 }
 0x3c6   :  { %6188 = vmatmul.mubr.msk.f32.vlgmr.msra.gmra.mrb[14].mxu1 %vm221_vm3, %v917_v47 }
 0x3c7   :  { %6191 = vmatpush3.msra.mxu1 %v6928_v54  ;;  %6192 = vmatprep.mubr.msk.f32.mxu1 %vm6695_vm2, %v6694_v27  ;;  %v6566_v49 = vpop.eup %6565 }
 0x3c8   :  { %6195 = vmatprep.subr.mxu1 %v6694_v27  ;;  %v919_v50 = vmul.f32 %v6566_v49, %v6999_v7  ;;  %v1699_v55 = vpop.permute.xlu0 %1698 }
 0x3ca   :  { %6193 = vmatmul.mubr.msk.f32.vlgmr.msra.gmra.mrb[16].mxu1 %vm221_vm3, %v918_v29 }
 0x3cb   :  { %6196 = vmatpush3.msra.mxu1 %v6975_v30  ;;  %6197 = vmatprep.mubr.msk.f32.mxu1 %vm6695_vm2, %v6694_v27  ;;  %v1777_v30 = vpop.permute.xlu1 %1776 }
 0x3cc   :  { %6200 = vmatprep.subr.mxu1 %v6694_v27  ;;  %v1697_v59 = vpop.permute.xlu0 %1696 }
 0x3ce   :  { %6198 = vmatmul.mubr.msk.f32.vlgmr.msra.gmra.mrb[18].mxu1 %vm221_vm3, %v919_v50 }
 0x3cf   :  { %v6568_v54 = vpop.eup %6567  ;;  %6201 = vmatpush3.msra.mxu1 %v6936_v56  ;;  %6202 = vmatprep.mubr.msk.f32.mxu1 %vm6695_vm2, %v6694_v27  ;;  %v1775_v52 = vpop.permute.xlu1 %1774 }
 0x3d0   :  { %6205 = vmatprep.subr.mxu1 %v6694_v27  ;;  %v920_v51 = vmul.f32 %v6568_v54, %v7003_v9  ;;  %v1855_v61 = vpop.permute.xlu0 %1854 }
 0x3d2   :  { %6203 = vmatmul.mubr.msk.f32.vlgmr.msra.gmra.mrb[20].mxu1 %vm221_vm3, %v920_v51 }
 0x3d3   :  { %6206 = vmatpush3.msra.mxu1 %v6977_v32  ;;  %6207 = vmatprep.mubr.msk.f32.mxu1 %vm6695_vm2, %v6694_v27 }
 0x3d4   :  { %6215 = vmatprep.subr.mxu1 %v6694_v27  ;;  %v1853_v1 = vpop.permute.xlu0 %1852 }
 0x3d8   :  { %v2011_v3 = vpop.permute.xlu0 %2010 }
 0x3dc   :  { %v2009_v6 = vpop.permute.xlu0 %2008 }
 0x3f5   :  { %v903_v56 = vpop.xlane.xlu1 %902 }
 0x3f6   :  { %6569 = vrcp.f32 %v903_v56 }
 0x3f9   :  { %v906_v57 = vpop.xlane.xlu1 %905 }
 0x3fa   :  { %6571 = vrcp.f32 %v906_v57 }
 0x3fd   :  { %v1933_v63 = vpop.permute.xlu1 %1932 }
 0x400   :  { %v6570_v60 = vpop.eup %6569 }
 0x401   :  { %v921_v62 = vmul.f32 %v6570_v60, %v7025_v17  ;;  %v1931_v2 = vpop.permute.xlu1 %1930 }
 0x403   :  { %6208 = vmatmul.mubr.msk.f32.vlgmr.msra.gmra.mrb[22].mxu1 %vm221_vm3, %v921_v62 }
 0x404   :  { %v6572_v32 = vpop.eup %6571  ;;  %6216 = vmatpush3.xpose.msk.msra.mxu1 %vm221_vm3, %v7041_v23  ;;  %6217 = vmatprep.mubr.msk.f32.mxu1 %vm6695_vm2, %v6694_v27 }
 0x405   :  { %6225 = vmatprep.subr.mxu1 %v6694_v27  ;;  %v922_v0 = vmul.f32 %v6572_v32, %v7029_v19  ;;  %v2089_v5 = vpop.permute.xlu1 %2088 }
 0x407   :  { %6213 = vmatmul.mubr.msk.f32.vlgmr.msra.gmra.mrb[14].mxu0 %vm221_vm3, %v922_v0  ;;  %6218 = vmatmul.mubr.msk.f32.vlgmr.msra.gmra.mrb[24].mxu1 %vm221_vm3, %v1541_v42 }
 0x408   :  { %6221 = vmatpush3.xpose.msk.msra.mxu0 %vm221_vm3, %v7035_v21  ;;  %6226 = vmatpush3.xpose.msk.msra.mxu1 %vm221_vm3, %v1699_v55 }
 0x409   :  { %6222 = vmatprep.mubr.msk.f32.mxu0 %vm6695_vm2, %v6694_v27  ;;  %6227 = vmatprep.mubr.msk.f32.mxu1 %vm6695_vm2, %v6694_v27  ;;  %v2087_v7 = vpop.permute.xlu1 %2086 }
 0x40a   :  { %6230 = vmatprep.subr.mxu0 %v6694_v27  ;;  %6235 = vmatprep.subr.mxu1 %v6694_v27 }
 0x40b   :  { %6223 = vmatmul.mubr.msk.f32.vlgmr.msra.gmra.mrb[16].mxu0 %vm221_vm3, %v1619_v38  ;;  %6228 = vmatmul.mubr.msk.f32.vlgmr.msra.gmra.mrb[26].mxu1 %vm221_vm3, %v1697_v59 }
 0x40c   :  { %6231 = vmatpush3.xpose.msk.msra.mxu0 %vm221_vm3, %v1777_v30  ;;  %6236 = vmatpush3.xpose.msk.msra.mxu1 %vm221_vm3, %v1855_v61 }
 0x40d   :  { %6232 = vmatprep.mubr.msk.f32.mxu0 %vm6695_vm2, %v6694_v27  ;;  %6237 = vmatprep.mubr.msk.f32.mxu1 %vm6695_vm2, %v6694_v27 }
 0x40e   :  { %6240 = vmatprep.subr.mxu0 %v6694_v27  ;;  %6245 = vmatprep.subr.mxu1 %v6694_v27 }
 0x40f   :  { %6233 = vmatmul.mubr.msk.f32.vlgmr.msra.gmra.mrb[18].mxu0 %vm221_vm3, %v1775_v52  ;;  %6238 = vmatmul.mubr.msk.f32.vlgmr.msra.gmra.mrb[28].mxu1 %vm221_vm3, %v1853_v1 }
 0x410   :  { %6241 = vmatpush3.xpose.msk.msra.mxu0 %vm221_vm3, %v1933_v63  ;;  %6246 = vmatpush3.xpose.msk.msra.mxu1 %vm221_vm3, %v2011_v3 }
 0x411   :  { %6242 = vmatprep.mubr.msk.f32.mxu0 %vm6695_vm2, %v6694_v27  ;;  %6247 = vmatprep.mubr.msk.f32.mxu1 %vm6695_vm2, %v6694_v27 }
 0x412   :  { %6250 = vmatprep.subr.mxu0 %v6694_v27  ;;  %6255 = vmatprep.subr.mxu1 %v6694_v27 }
 0x413   :  { %6243 = vmatmul.mubr.msk.f32.vlgmr.msra.gmra.mrb[20].mxu0 %vm221_vm3, %v1931_v2  ;;  %6248 = vmatmul.mubr.msk.f32.vlgmr.msra.gmra.mrb[30].mxu1 %vm221_vm3, %v2009_v6 }
 0x414   :  { %6251 = vmatpush3.xpose.msk.msra.mxu0 %vm221_vm3, %v2089_v5  ;;  %6252 = vmatprep.mubr.msk.f32.mxu0 %vm6695_vm2, %v6694_v27 }
 0x415   :  { %6260 = vmatprep.subr.mxu0 %v6694_v27  ;;  %6257 = vmatprep.mubr.msk.f32.mxu1 %vm6695_vm2, %v6694_v27 }
 0x417   :  { %6253 = vmatmul.mubr.msk.f32.vlgmr.msra.gmra.mrb[22].mxu0 %vm221_vm3, %v2087_v7 }
 0x418   :  { %6262 = vmatprep.mubr.msk.f32.mxu0 %vm6695_vm2, %v6694_v27 }
 0x464   :  { %v995_v8 = vpop.f32.mrb[10].mxu1 }
 0x465   :  { %1531 = vst.msk [vmem:[#allocation2] sm:$0xff] %vm221_vm3, %v995_v8  ;;  %v6179_v9 = vpop.f32.mrb[11].mxu1 }
 0x470   :  { %v1071_v10 = vpop.f32.mrb[12].mxu1 }
 0x471   :  { %1532 = vst.msk [vmem:[#allocation2 + $0x8] sm:$0xff] %vm221_vm3, %v1071_v10  ;;  %v6184_v11 = vpop.f32.mrb[13].mxu1 }
 0x499   :  { %v1147_v12 = vpop.f32.mrb[14].mxu1 }
 0x49a   :  { %1533 = vst.msk [vmem:[#allocation2 + $0x10] sm:$0xff] %vm221_vm3, %v1147_v12  ;;  %v6189_v13 = vpop.f32.mrb[15].mxu1 }
 0x49d   :  { %v1223_v14 = vpop.f32.mrb[16].mxu1 }
 0x49e   :  { %1534 = vst.msk [vmem:[#allocation2 + $0x18] sm:$0xff] %vm221_vm3, %v1223_v14  ;;  %v6194_v15 = vpop.f32.mrb[17].mxu1 }
 0x4a1   :  { %v1299_v16 = vpop.f32.mrb[18].mxu1 }
 0x4a2   :  { %1535 = vst.msk [vmem:[#allocation2 + $0x20] sm:$0xff] %vm221_vm3, %v1299_v16  ;;  %v6199_v17 = vpop.f32.mrb[19].mxu1 }
 0x4a5   :  { %v1375_v18 = vpop.f32.mrb[20].mxu1 }
 0x4a6   :  { %1536 = vst.msk [vmem:[#allocation2 + $0x28] sm:$0xff] %vm221_vm3, %v1375_v18  ;;  %v6204_v19 = vpop.f32.mrb[21].mxu1 }
 0x4d6   :  { %v1451_v20 = vpop.f32.mrb[22].mxu1 }
 0x4d7   :  { %1537 = vst.msk [vmem:[#allocation2 + $0x30] sm:$0xff] %vm221_vm3, %v1451_v20  ;;  %v6209_v21 = vpop.f32.mrb[23].mxu1 }
 0x4da   :  { %v1527_v22 = vpop.f32.mrb[14].mxu0  ;;  %v1614_v23 = vpop.f32.mrb[24].mxu1 }
 0x4db   :  { %1538 = vst.msk [vmem:[#allocation2 + $0x38] sm:$0xff] %vm221_vm3, %v1527_v22  ;;  %v1615_v24 = vadd.f32 %v1614_v23, %v6945_v58  ;;  %v6214_v25 = vpop.f32.mrb[15].mxu0  ;;  %v6219_v26 = vpop.f32.mrb[25].mxu1 }
 0x4dd   :  { %v2164_v28 = vsel %vm221_vm3, %v1615_v24, -inf }
 0x4de   :  { %v1692_v33 = vpop.f32.mrb[16].mxu0  ;;  %2165 = vmax.xlane.f32.xlu0 %v2164_v28  ;;  %v1770_v37 = vpop.f32.mrb[26].mxu1 }
 0x4df   :  { %v1693_v38 = vadd.f32 %v1692_v33, %v6945_v58  ;;  %v1771_v41 = vadd.f32 %v1770_v37, %v6945_v58  ;;  %v6224_v53 = vpop.f32.mrb[17].mxu0  ;;  %v6229_v42 = vpop.f32.mrb[27].mxu1 }
 0x4e1   :  { %v2167_v45 = vsel %vm221_vm3, %v1693_v38, -inf  ;;  %v2170_v46 = vsel %vm221_vm3, %v1771_v41, -inf }
 0x4e2   :  { %2168 = vmax.xlane.f32.xlu1 %v2167_v45  ;;  %v1848_v47 = vpop.f32.mrb[18].mxu0  ;;  %2171 = vmax.xlane.f32.xlu0 %v2170_v46  ;;  %v1926_v48 = vpop.f32.mrb[28].mxu1 }
 0x4e3   :  { %v1849_v29 = vadd.f32 %v1848_v47, %v6945_v58  ;;  %v6234_v49 = vpop.f32.mrb[19].mxu0  ;;  %v6239_v50 = vpop.f32.mrb[29].mxu1  ;;  %v7170_v32 = vadd.f32 %v1926_v48, %v6945_v58 }
 0x4e5   :  { %v2173_v54 = vsel %vm221_vm3, %v1849_v29, -inf  ;;  %v2176_v0 = vsel %vm221_vm3, %v7170_v32, -inf }
 0x4e6   :  { %v2004_v51 = vpop.f32.mrb[20].mxu0  ;;  %2174 = vmax.xlane.f32.xlu0 %v2173_v54  ;;  %v2082_v30 = vpop.f32.mrb[30].mxu1 }
 0x4e7   :  { %v2005_v52 = vadd.f32 %v2004_v51, %v6945_v58  ;;  %v6244_v55 = vpop.f32.mrb[21].mxu0  ;;  %v6249_v56 = vpop.f32.mrb[31].mxu1  ;;  %v7173_v63 = vadd.f32 %v2082_v30, %v6945_v58 }
 0x4e9   :  { %v2179_v57 = vsel %vm221_vm3, %v2005_v52, -inf  ;;  %v2182_v1 = vsel %vm221_vm3, %v7173_v63, -inf }
 0x4ea   :  { %v2160_v59 = vpop.f32.mrb[22].mxu0  ;;  %2180 = vmax.xlane.f32.xlu0 %v2179_v57 }
 0x4eb   :  { %v2161_v60 = vadd.f32 %v2160_v59, %v6945_v58  ;;  %v6254_v61 = vpop.f32.mrb[23].mxu0 }
 0x4ed   :  { %v2185_v62 = vsel %vm221_vm3, %v2161_v60, -inf }
 0x4ee   :  { %2186 = vmax.xlane.f32.xlu0 %v2185_v62 }
 0x4f3   :  { %2252 = vrot.lane.b32.xlu1 %v6854_v31, %s6700_s18 }
 0x4f7   :  { %2404 = vrot.lane.b32.xlu1 %v6859_v35, %s6700_s18 }
 0x4fb   :  { %2480 = vrot.lane.b32.xlu1 %v6861_v36, %s6700_s18 }
 0x4ff   :  { %2632 = vrot.lane.b32.xlu1 %v6867_v40, %s6700_s18 }
 0x503   :  { %2784 = vrot.lane.b32.xlu1 %v6873_v44, %s6700_s18 }
 0x504   :  { %2328 = vrot.lane.b32.xlu0 %v6857_v34, %s6700_s18 }
 0x507   :  { %2982 = vrot.lane.b32.xlu1 %v6857_v34, %s6701_s19 }
 0x508   :  { %2556 = vrot.lane.b32.xlu0 %v6865_v39, %s6700_s18 }
 0x50b   :  { %2980 = vrot.lane.b32.xlu1 %v6857_v34, %s6702_s20 }
 0x50c   :  { %2708 = vrot.lane.b32.xlu0 %v6871_v43, %s6700_s18 }
 0x510   :  { %2904 = vrot.lane.b32.xlu0 %v6854_v31, %s6701_s19 }
 0x514   :  { %2902 = vrot.lane.b32.xlu0 %v6854_v31, %s6702_s20 }
 0x518   :  { %3060 = vrot.lane.b32.xlu0 %v6859_v35, %s6701_s19 }
 0x52f   :  { %2177 = vmax.xlane.f32.xlu1 %v2176_v0 }
 0x533   :  { %2183 = vmax.xlane.f32.xlu1 %v2182_v1 }
 0x544   :  { %3138 = vrot.lane.b32.xlu1 %v6861_v36, %s6701_s19 }
 0x56b   :  { %v2166_v2 = vpop.xlane.xlu0 %2165 }
 0x56c   :  { %v2188_v3 = vsub.f32 %v1615_v24, %v2166_v2 }
 0x56e   :  { %v2196_v5 = vmul.f32 1.442695, %v2188_v3 }
 0x56f   :  { %v2169_v6 = vpop.xlane.xlu1 %2168  ;;  %v2172_v7 = vpop.xlane.xlu0 %2171 }
 0x570   :  { %6573 = vpow2.f32 %v2196_v5  ;;  %v2189_v8 = vsub.f32 %v1693_v38, %v2169_v6  ;;  %v2190_v58 = vsub.f32 %v1771_v41, %v2172_v7 }
 0x572   :  { %v2198_v9 = vmul.f32 1.442695, %v2189_v8  ;;  %v2200_v10 = vmul.f32 1.442695, %v2190_v58 }
 0x573   :  { %v2253_v11 = vpop.permute.xlu1 %2252  ;;  %v2175_v12 = vpop.xlane.xlu0 %2174 }
 0x574   :  { %6575 = vpow2.f32 %v2198_v9  ;;  %v2191_v13 = vsub.f32 %v1849_v29, %v2175_v12  ;;  %6256 = vmatpush3.msra.mxu1 %v2253_v11 }
 0x575   :  { %6577 = vpow2.f32 %v2200_v10  ;;  %6265 = vmatprep.subr.mxu1 %v6694_v27 }
 0x576   :  { %v2202_v14 = vmul.f32 1.442695, %v2191_v13 }
 0x577   :  { %v2181_v15 = vpop.xlane.xlu0 %2180  ;;  %v7209_v45 = vpop.permute.xlu1 %2404 }
 0x578   :  { %6579 = vpow2.f32 %v2202_v14  ;;  %v2193_v16 = vsub.f32 %v2005_v52, %v2181_v15 }
 0x57a   :  { %v7182_v17 = vpop.eup %6573  ;;  %v2206_v18 = vmul.f32 1.442695, %v2193_v16 }
 0x57b   :  { %v2187_v19 = vpop.xlane.xlu0 %2186  ;;  %v2212_v20 = vsel %vm221_vm3, %v7182_v17, 0.0  ;;  %v7211_v46 = vpop.permute.xlu1 %2480 }
 0x57c   :  { %6581 = vpow2.f32 %v2206_v18  ;;  %v2195_v21 = vsub.f32 %v2161_v60, %v2187_v19  ;;  %2213 = vadd.xlane.f32.xlu1 %v2212_v20 }
 0x57e   :  { %v7186_v22 = vpop.eup %6575  ;;  %v2210_v23 = vmul.f32 1.442695, %v2195_v21 }
 0x57f   :  { %v7188_v24 = vpop.eup %6577  ;;  %v2329_v25 = vpop.permute.xlu0 %2328  ;;  %v2215_v26 = vsel %vm221_vm3, %v7186_v22, 0.0 }
 0x580   :  { %6583 = vpow2.f32 %v2210_v23  ;;  %2216 = vadd.xlane.f32.xlu0 %v2215_v26  ;;  %v2218_v28 = vsel %vm221_vm3, %v7188_v24, 0.0  ;;  %6261 = vmatpush3.msra.mxu0 %v2329_v25  ;;  %v7215_v47 = vpop.permute.xlu1 %2632 }
 0x581   :  { %2219 = vadd.xlane.f32.xlu1 %v2218_v28  ;;  %6270 = vmatprep.subr.mxu0 %v6694_v27 }
 0x582   :  { %v7195_v33 = vpop.eup %6579 }
 0x583   :  { %v2221_v37 = vsel %vm221_vm3, %v7195_v33, 0.0  ;;  %v2557_v61 = vpop.permute.xlu0 %2556 }
 0x584   :  { %2222 = vadd.xlane.f32.xlu0 %v2221_v37  ;;  %v7221_v48 = vpop.permute.xlu1 %2784 }
 0x586   :  { %v7199_v38 = vpop.eup %6581 }
 0x587   :  { %v2227_v41 = vsel %vm221_vm3, %v7199_v38, 0.0  ;;  %v7263_v62 = vpop.permute.xlu0 %2708 }
 0x588   :  { %2228 = vadd.xlane.f32.xlu0 %v2227_v41  ;;  %v7225_v29 = vpop.permute.xlu1 %2982 }
 0x58a   :  { %v7203_v53 = vpop.eup %6583 }
 0x58b   :  { %v2233_v42 = vsel %vm221_vm3, %v7203_v53, 0.0 }
 0x58c   :  { %2234 = vadd.xlane.f32.xlu0 %v2233_v42  ;;  %v7231_v49 = vpop.permute.xlu1 %2980 }
 0x592   :  { %3136 = vrot.lane.b32.xlu1 %v6861_v36, %s6702_s20 }
 0x5a2   :  { %3058 = vrot.lane.b32.xlu0 %v6859_v35, %s6702_s20 }
 0x5a6   :  { %3216 = vrot.lane.b32.xlu0 %v6865_v39, %s6701_s19 }
 0x5aa   :  { %3214 = vrot.lane.b32.xlu0 %v6865_v39, %s6702_s20 }
 0x5ae   :  { %3372 = vrot.lane.b32.xlu0 %v6871_v43, %s6701_s19 }
 0x5b2   :  { %3370 = vrot.lane.b32.xlu0 %v6871_v43, %s6702_s20 }
 0x5b6   :  { %3690 = vrot.lane.b32.xlu0 %v6857_v34, %s6703_s21 }
 0x5ba   :  { %3918 = vrot.lane.b32.xlu0 %v6865_v39, %s6703_s21 }
 0x5bc   :  { %v2178_v50 = vpop.xlane.xlu1 %2177 }
 0x5bd   :  { %v2192_v54 = vsub.f32 %v7170_v32, %v2178_v50  ;;  %v7267_v32 = vpop.permute.xlu0 %2904 }
 0x5be   :  { %4070 = vrot.lane.b32.xlu0 %v6871_v43, %s6703_s21 }
 0x5bf   :  { %v2204_v51 = vmul.f32 1.442695, %v2192_v54 }
 0x5c0   :  { %v2184_v30 = vpop.xlane.xlu1 %2183 }
 0x5c1   :  { %6585 = vpow2.f32 %v2204_v51  ;;  %v2194_v52 = vsub.f32 %v7173_v63, %v2184_v30  ;;  %v7273_v63 = vpop.permute.xlu0 %2902 }
 0x5c2   :  { %4266 = vrot.lane.b32.xlu0 %v6854_v31, %s6704_s22 }
 0x5c3   :  { %v2208_v55 = vmul.f32 1.442695, %v2194_v52 }
 0x5c4   :  { %v3139_v0 = vpop.permute.xlu1 %3138 }
 0x5c5   :  { %6587 = vpow2.f32 %v2208_v55  ;;  %v7277_v1 = vpop.permute.xlu0 %3060 }
 0x5c6   :  { %4264 = vrot.lane.b32.xlu0 %v6854_v31, %s6705_s23 }
 0x5cb   :  { %v7243_v56 = vpop.eup %6585 }
 0x5cc   :  { %v2224_v57 = vsel %vm221_vm3, %v7243_v56, 0.0 }
 0x5cd   :  { %2225 = vadd.xlane.f32.xlu1 %v2224_v57 }
 0x5cf   :  { %v7247_v59 = vpop.eup %6587 }
 0x5d0   :  { %v2230_v60 = vsel %vm221_vm3, %v7247_v59, 0.0 }
 0x5d1   :  { %2231 = vadd.xlane.f32.xlu1 %v2230_v60 }
 0x5e2   :  { %3294 = vrot.lane.b32.xlu1 %v6867_v40, %s6701_s19 }
 0x5e6   :  { %3292 = vrot.lane.b32.xlu1 %v6867_v40, %s6702_s20 }
 0x5ea   :  { %3450 = vrot.lane.b32.xlu1 %v6873_v44, %s6701_s19 }
 0x5ee   :  { %3448 = vrot.lane.b32.xlu1 %v6873_v44, %s6702_s20 }
 0x5f2   :  { %3614 = vrot.lane.b32.xlu1 %v6854_v31, %s6703_s21 }
 0x5f6   :  { %3766 = vrot.lane.b32.xlu1 %v6859_v35, %s6703_s21 }
 0x5fa   :  { %3842 = vrot.lane.b32.xlu1 %v6861_v36, %s6703_s21 }
 0x5fe   :  { %3994 = vrot.lane.b32.xlu1 %v6867_v40, %s6703_s21 }
 0x602   :  { %4146 = vrot.lane.b32.xlu1 %v6873_v44, %s6703_s21 }
 0x606   :  { %4344 = vrot.lane.b32.xlu1 %v6857_v34, %s6704_s22 }
 0x609   :  { %v2214_v2 = vpop.xlane.xlu1 %2213 }
 0x60a   :  { %6589 = vrcp.f32 %v2214_v2  ;;  %4342 = vrot.lane.b32.xlu1 %v6857_v34, %s6705_s23 }
 0x60d   :  { %v2217_v3 = vpop.xlane.xlu0 %2216 }
 0x60e   :  { %v2220_v5 = vpop.xlane.xlu1 %2219  ;;  %6591 = vrcp.f32 %v2217_v3 }
 0x60f   :  { %6593 = vrcp.f32 %v2220_v5 }
 0x611   :  { %v2223_v6 = vpop.xlane.xlu0 %2222 }
 0x612   :  { %6595 = vrcp.f32 %v2223_v6  ;;  %v3137_v20 = vpop.permute.xlu1 %3136 }
 0x614   :  { %v6590_v7 = vpop.eup %6589 }
 0x615   :  { %v2229_v8 = vpop.xlane.xlu0 %2228  ;;  %v2244_v58 = vmul.f32 %v6590_v7, %v7182_v17 }
 0x616   :  { %6597 = vrcp.f32 %v2229_v8 }
 0x617   :  { %6258 = vmatmul.mubr.msk.f32.vlgmr.msra.gmra.mrb[32].mxu1 %vm221_vm3, %v2244_v58 }
 0x618   :  { %v6592_v9 = vpop.eup %6591  ;;  %6266 = vmatpush3.msra.mxu1 %v7209_v45  ;;  %6267 = vmatprep.mubr.msk.f32.mxu1 %vm6695_vm2, %v6694_v27 }
 0x619   :  { %v6594_v10 = vpop.eup %6593  ;;  %v2235_v11 = vpop.xlane.xlu0 %2234  ;;  %6275 = vmatprep.subr.mxu1 %v6694_v27  ;;  %v2245_v12 = vmul.f32 %v6592_v9, %v7186_v22 }
 0x61a   :  { %6599 = vrcp.f32 %v2235_v11  ;;  %v2246_v13 = vmul.f32 %v6594_v10, %v7188_v24 }
 0x61b   :  { %6263 = vmatmul.mubr.msk.f32.vlgmr.msra.gmra.mrb[24].mxu0 %vm221_vm3, %v2245_v12 }
 0x61c   :  { %v6596_v14 = vpop.eup %6595  ;;  %6268 = vmatmul.mubr.msk.f32.vlgmr.msra.gmra.mrb[34].mxu1 %vm221_vm3, %v2246_v13  ;;  %6271 = vmatpush3.msra.mxu0 %v7211_v46 }
 0x61d   :  { %6276 = vmatpush3.msra.mxu1 %v2557_v61  ;;  %6272 = vmatprep.mubr.msk.f32.mxu0 %vm6695_vm2, %v6694_v27  ;;  %v2247_v15 = vmul.f32 %v6596_v14, %v7195_v33  ;;  %v3059_v21 = vpop.permute.xlu0 %3058 }
 0x61e   :  { %6280 = vmatprep.subr.mxu0 %v6694_v27  ;;  %6277 = vmatprep.mubr.msk.f32.mxu1 %vm6695_vm2, %v6694_v27 }
 0x61f   :  { %6273 = vmatmul.mubr.msk.f32.vlgmr.msra.gmra.mrb[26].mxu0 %vm221_vm3, %v2247_v15  ;;  %6285 = vmatprep.subr.mxu1 %v6694_v27 }
 0x620   :  { %v6598_v16 = vpop.eup %6597  ;;  %6281 = vmatpush3.msra.mxu0 %v7215_v47  ;;  %6282 = vmatprep.mubr.msk.f32.mxu0 %vm6695_vm2, %v6694_v27 }
 0x621   :  { %6290 = vmatprep.subr.mxu0 %v6694_v27  ;;  %v2249_v17 = vmul.f32 %v6598_v16, %v7199_v38  ;;  %v3217_v22 = vpop.permute.xlu0 %3216 }
 0x623   :  { %6283 = vmatmul.mubr.msk.f32.vlgmr.msra.gmra.mrb[28].mxu0 %vm221_vm3, %v2249_v17 }
 0x624   :  { %v6600_v18 = vpop.eup %6599  ;;  %6291 = vmatpush3.msra.mxu0 %v7221_v48  ;;  %6292 = vmatprep.mubr.msk.f32.mxu0 %vm6695_vm2, %v6694_v27 }
 0x625   :  { %v2251_v19 = vmul.f32 %v6600_v18, %v7203_v53  ;;  %6300 = vmatprep.subr.mxu0 %v6694_v27  ;;  %v3215_v24 = vpop.permute.xlu0 %3214 }
 0x627   :  { %6293 = vmatmul.mubr.msk.f32.vlgmr.msra.gmra.mrb[30].mxu0 %vm221_vm3, %v2251_v19 }
 0x628   :  { %6302 = vmatprep.mubr.msk.f32.mxu0 %vm6695_vm2, %v6694_v27 }
 0x629   :  { %v3373_v28 = vpop.permute.xlu0 %3372 }
 0x62b   :  { %6301 = vmatpush3.xpose.msk.msra.mxu0 %vm221_vm3, %v7225_v29 }
 0x62c   :  { %6310 = vmatprep.subr.mxu0 %v6694_v27 }
 0x62d   :  { %v3371_v53 = vpop.permute.xlu0 %3370 }
 0x62e   :  { %6303 = vmatmul.mubr.msk.f32.vlgmr.msra.gmra.mrb[32].mxu0 %vm221_vm3, %v7231_v49 }
 0x62f   :  { %6311 = vmatpush3.xpose.msk.msra.mxu0 %vm221_vm3, %v3139_v0  ;;  %6312 = vmatprep.mubr.msk.f32.mxu0 %vm6695_vm2, %v6694_v27 }
 0x630   :  { %6320 = vmatprep.subr.mxu0 %v6694_v27 }
 0x631   :  { %v3691_v47 = vpop.permute.xlu0 %3690 }
 0x632   :  { %6313 = vmatmul.mubr.msk.f32.vlgmr.msra.gmra.mrb[34].mxu0 %vm221_vm3, %v3137_v20 }
 0x633   :  { %6322 = vmatprep.mubr.msk.f32.mxu0 %vm6695_vm2, %v6694_v27 }
 0x65a   :  { %v2226_v23 = vpop.xlane.xlu1 %2225 }
 0x65b   :  { %6601 = vrcp.f32 %v2226_v23 }
 0x65e   :  { %v2232_v25 = vpop.xlane.xlu1 %2231 }
 0x65f   :  { %6603 = vrcp.f32 %v2232_v25 }
 0x662   :  { %v3295_v26 = vpop.permute.xlu1 %3294 }
 0x663   :  { %6321 = vmatpush3.xpose.msk.msra.mxu0 %vm221_vm3, %v3295_v26 }
 0x664   :  { %6330 = vmatprep.subr.mxu0 %v6694_v27 }
 0x665   :  { %v6602_v33 = vpop.eup %6601 }
 0x666   :  { %v3293_v37 = vpop.permute.xlu1 %3292  ;;  %v2248_v38 = vmul.f32 %v6602_v33, %v7243_v56 }
 0x667   :  { %6323 = vmatmul.mubr.msk.f32.vlgmr.msra.gmra.mrb[36].mxu0 %vm221_vm3, %v3293_v37 }
 0x668   :  { %6278 = vmatmul.mubr.msk.f32.vlgmr.msra.gmra.mrb[36].mxu1 %vm221_vm3, %v2248_v38  ;;  %6332 = vmatprep.mubr.msk.f32.mxu0 %vm6695_vm2, %v6694_v27 }
 0x669   :  { %v6604_v41 = vpop.eup %6603  ;;  %6286 = vmatpush3.msra.mxu1 %v7263_v62  ;;  %6287 = vmatprep.mubr.msk.f32.mxu1 %vm6695_vm2, %v6694_v27  ;;  %v6669_v62 = vld [vmem:[%s7798_s5] sm:$0xff] }
 0x66a   :  { %v2250_v42 = vmul.f32 %v6604_v41, %v7247_v59  ;;  %v3451_v45 = vpop.permute.xlu1 %3450  ;;  %6295 = vmatprep.subr.mxu1 %v6694_v27 }
 0x66b   :  { %6331 = vmatpush3.xpose.msk.msra.mxu0 %vm221_vm3, %v3451_v45 }
 0x66c   :  { %6288 = vmatmul.mubr.msk.f32.vlgmr.msra.gmra.mrb[38].mxu1 %vm221_vm3, %v2250_v42  ;;  %6340 = vmatprep.subr.mxu0 %v6694_v27 }
 0x66d   :  { %6297 = vmatprep.mubr.msk.f32.mxu1 %vm6695_vm2, %v6694_v27 }
 0x66e   :  { %v3449_v46 = vpop.permute.xlu1 %3448 }
 0x66f   :  { %6333 = vmatmul.mubr.msk.f32.vlgmr.msra.gmra.mrb[38].mxu0 %vm221_vm3, %v3449_v46 }
 0x670   :  { %6296 = vmatpush3.xpose.msk.msra.mxu1 %vm221_vm3, %v7267_v32  ;;  %6341 = vmatpush3.msra.mxu0 %v3691_v47  ;;  %v7420_v47 = vpop.permute.xlu0 %3918 }
 0x671   :  { %6305 = vmatprep.subr.mxu1 %v6694_v27  ;;  %6342 = vmatprep.mubr.msk.f32.mxu0 %vm6695_vm2, %v6694_v27 }
 0x672   :  { %6350 = vmatprep.subr.mxu0 %v6694_v27  ;;  %v3615_v48 = vpop.permute.xlu1 %3614 }
 0x673   :  { %6298 = vmatmul.mubr.msk.f32.vlgmr.msra.gmra.mrb[40].mxu1 %vm221_vm3, %v7273_v63 }
 0x674   :  { %6306 = vmatpush3.xpose.msk.msra.mxu1 %vm221_vm3, %v7277_v1  ;;  %6307 = vmatprep.mubr.msk.f32.mxu1 %vm6695_vm2, %v6694_v27 }
 0x675   :  { %6315 = vmatprep.subr.mxu1 %v6694_v27 }
 0x676   :  { %v7414_v42 = vpop.permute.xlu1 %3766 }
 0x677   :  { %6308 = vmatmul.mubr.msk.f32.vlgmr.msra.gmra.mrb[42].mxu1 %vm221_vm3, %v3059_v21 }
 0x678   :  { %6316 = vmatpush3.xpose.msk.msra.mxu1 %vm221_vm3, %v3217_v22  ;;  %6317 = vmatprep.mubr.msk.f32.mxu1 %vm6695_vm2, %v6694_v27 }
 0x679   :  { %6325 = vmatprep.subr.mxu1 %v6694_v27 }
 0x67a   :  { %v7416_v45 = vpop.permute.xlu1 %3842 }
 0x67b   :  { %6318 = vmatmul.mubr.msk.f32.vlgmr.msra.gmra.mrb[44].mxu1 %vm221_vm3, %v3215_v24 }
 0x67c   :  { %6326 = vmatpush3.xpose.msk.msra.mxu1 %vm221_vm3, %v3373_v28  ;;  %6327 = vmatprep.mubr.msk.f32.mxu1 %vm6695_vm2, %v6694_v27 }
 0x67d   :  { %6335 = vmatprep.subr.mxu1 %v6694_v27 }
 0x67e   :  { %v7418_v46 = vpop.permute.xlu1 %3994 }
 0x67f   :  { %6328 = vmatmul.mubr.msk.f32.vlgmr.msra.gmra.mrb[46].mxu1 %vm221_vm3, %v3371_v53 }
 0x680   :  { %6336 = vmatpush3.msra.mxu1 %v3615_v48  ;;  %6337 = vmatprep.mubr.msk.f32.mxu1 %vm6695_vm2, %v6694_v27 }
 0x681   :  { %6345 = vmatprep.subr.mxu1 %v6694_v27 }
 0x682   :  { %v7422_v48 = vpop.permute.xlu1 %4146 }
 0x6ea   :  { %v7371_v29 = vpop.f32.mrb[32].mxu1 }
 0x6eb   :  { %v6259_v49 = vpop.f32.mrb[33].mxu1 }
 0x6ec   :  { %v7424_v49 = vpop.permute.xlu0 %4070 }
 0x6ee   :  { %v7373_v50 = vpop.f32.mrb[24].mxu0 }
 0x6ef   :  { %v7375_v54 = vpop.f32.mrb[34].mxu1  ;;  %v6264_v51 = vpop.f32.mrb[25].mxu0 }
 0x6f0   :  { %v6269_v30 = vpop.f32.mrb[35].mxu1  ;;  %v7426_v51 = vpop.permute.xlu1 %4344 }
 0x6f1   :  { %v7428_v30 = vpop.permute.xlu0 %4266 }
 0x6f2   :  { %v7377_v52 = vpop.f32.mrb[26].mxu0 }
 0x6f3   :  { %v6274_v55 = vpop.f32.mrb[27].mxu0 }
 0x6f4   :  { %v7430_v55 = vpop.permute.xlu1 %4342 }
 0x6f6   :  { %v7379_v56 = vpop.f32.mrb[28].mxu0 }
 0x6f7   :  { %v6284_v57 = vpop.f32.mrb[29].mxu0 }
 0x6f8   :  { %v7432_v57 = vpop.permute.xlu0 %4264 }
 0x6fa   :  { %v7381_v59 = vpop.f32.mrb[30].mxu0 }
 0x6fb   :  { %v6294_v60 = vpop.f32.mrb[31].mxu0 }
 0x701   :  { %v3054_v61 = vpop.f32.mrb[32].mxu0 }
 0x702   :  { %v3055_v32 = vadd.f32 %v6669_v62, %v3054_v61  ;;  %v6304_v63 = vpop.f32.mrb[33].mxu0 }
 0x704   :  { %v3529_v0 = vsel %vm221_vm3, %v3055_v32, -inf }
 0x705   :  { %3530 = vmax.xlane.f32.xlu1 %v3529_v0  ;;  %v3210_v1 = vpop.f32.mrb[34].mxu0 }
 0x706   :  { %v3211_v2 = vadd.f32 %v6669_v62, %v3210_v1  ;;  %v6314_v3 = vpop.f32.mrb[35].mxu0 }
 0x708   :  { %v3535_v5 = vsel %vm221_vm3, %v3211_v2, -inf }
 0x709   :  { %3536 = vmax.xlane.f32.xlu0 %v3535_v5 }
 0x716   :  { %4500 = vrot.lane.b32.xlu1 %v6861_v36, %s6704_s22 }
 0x73a   :  { %v3366_v6 = vpop.f32.mrb[36].mxu0 }
 0x73b   :  { %v7390_v7 = vpop.f32.mrb[36].mxu1  ;;  %v6324_v8 = vpop.f32.mrb[37].mxu0  ;;  %v3367_v16 = vadd.f32 %v6669_v62, %v3366_v6 }
 0x73c   :  { %v6279_v58 = vpop.f32.mrb[37].mxu1 }
 0x73d   :  { %v3541_v21 = vsel %vm221_vm3, %v3367_v16, -inf }
 0x73f   :  { %v7392_v9 = vpop.f32.mrb[38].mxu1 }
 0x740   :  { %v6289_v10 = vpop.f32.mrb[39].mxu1 }
 0x742   :  { %v3522_v11 = vpop.f32.mrb[38].mxu0 }
 0x743   :  { %v6334_v12 = vpop.f32.mrb[39].mxu0  ;;  %v7400_v25 = vadd.f32 %v6669_v62, %v3522_v11 }
 0x745   :  { %v3547_v41 = vsel %vm221_vm3, %v7400_v25, -inf }
 0x746   :  { %v2976_v13 = vpop.f32.mrb[40].mxu1 }
 0x747   :  { %v2977_v14 = vadd.f32 %v6669_v62, %v2976_v13  ;;  %v6299_v15 = vpop.f32.mrb[41].mxu1 }
 0x749   :  { %v3526_v17 = vsel %vm221_vm3, %v2977_v14, -inf }
 0x74a   :  { %3527 = vmax.xlane.f32.xlu0 %v3526_v17  ;;  %v3132_v18 = vpop.f32.mrb[42].mxu1 }
 0x74b   :  { %v6309_v19 = vpop.f32.mrb[43].mxu1  ;;  %v7395_v20 = vadd.f32 %v6669_v62, %v3132_v18 }
 0x74d   :  { %v3532_v26 = vsel %vm221_vm3, %v7395_v20, -inf }
 0x74e   :  { %3542 = vmax.xlane.f32.xlu0 %v3541_v21  ;;  %v3288_v22 = vpop.f32.mrb[44].mxu1 }
 0x74f   :  { %v7398_v23 = vadd.f32 %v6669_v62, %v3288_v22  ;;  %v6319_v24 = vpop.f32.mrb[45].mxu1 }
 0x751   :  { %v3538_v28 = vsel %vm221_vm3, %v7398_v23, -inf }
 0x752   :  { %3533 = vmax.xlane.f32.xlu0 %v3532_v26  ;;  %3539 = vmax.xlane.f32.xlu1 %v3538_v28  ;;  %v3444_v33 = vpop.f32.mrb[46].mxu1 }
 0x753   :  { %v7406_v37 = vadd.f32 %v6669_v62, %v3444_v33  ;;  %v6329_v38 = vpop.f32.mrb[47].mxu1 }
 0x755   :  { %v3544_v53 = vsel %vm221_vm3, %v7406_v37, -inf }
 0x756   :  { %3548 = vmax.xlane.f32.xlu0 %v3547_v41  ;;  %3545 = vmax.xlane.f32.xlu1 %v3544_v53 }
 0x76c   :  { %4422 = vrot.lane.b32.xlu0 %v6859_v35, %s6704_s22 }
 0x792   :  { %v3531_v60 = vpop.xlane.xlu1 %3530 }
 0x793   :  { %v3551_v61 = vsub.f32 %v3055_v32, %v3531_v60 }
 0x795   :  { %v3560_v62 = vmul.f32 1.442695, %v3551_v61 }
 0x796   :  { %v3537_v63 = vpop.xlane.xlu0 %3536 }
 0x797   :  { %6605 = vpow2.f32 %v3560_v62  ;;  %v3553_v0 = vsub.f32 %v3211_v2, %v3537_v63 }
 0x799   :  { %v3564_v1 = vmul.f32 1.442695, %v3553_v0 }
 0x79b   :  { %6607 = vpow2.f32 %v3564_v1 }
 0x7a1   :  { %v6606_v3 = vpop.eup %6605 }
 0x7a2   :  { %v3577_v5 = vsel %vm221_vm3, %v6606_v3, 0.0 }
 0x7a3   :  { %3578 = vadd.xlane.f32.xlu0 %v3577_v5 }
 0x7a5   :  { %v6608_v6 = vpop.eup %6607 }
 0x7a6   :  { %v3583_v8 = vsel %vm221_vm3, %v6608_v6, 0.0 }
 0x7a7   :  { %3584 = vadd.xlane.f32.xlu0 %v3583_v8 }
 0x7d7   :  { %v3528_v58 = vpop.xlane.xlu0 %3527 }
 0x7d8   :  { %v3550_v10 = vsub.f32 %v2977_v14, %v3528_v58 }
 0x7da   :  { %v3558_v11 = vmul.f32 1.442695, %v3550_v10 }
 0x7db   :  { %v3543_v12 = vpop.xlane.xlu0 %3542 }
 0x7dc   :  { %6609 = vpow2.f32 %v3558_v11  ;;  %v3555_v32 = vsub.f32 %v3367_v16, %v3543_v12  ;;  %v7448_v16 = vpop.permute.xlu1 %4500 }
 0x7de   :  { %v3568_v13 = vmul.f32 1.442695, %v3555_v32 }
 0x7df   :  { %v3534_v14 = vpop.xlane.xlu0 %3533 }
 0x7e0   :  { %6611 = vpow2.f32 %v3568_v13  ;;  %v3540_v19 = vpop.xlane.xlu1 %3539  ;;  %v3552_v21 = vsub.f32 %v7395_v20, %v3534_v14 }
 0x7e1   :  { %v3554_v24 = vsub.f32 %v7398_v23, %v3540_v19 }
 0x7e2   :  { %v3562_v26 = vmul.f32 1.442695, %v3552_v21 }
 0x7e3   :  { %v3549_v22 = vpop.xlane.xlu0 %3548  ;;  %v3566_v33 = vmul.f32 1.442695, %v3554_v24 }
 0x7e4   :  { %v3557_v28 = vsub.f32 %v7400_v25, %v3549_v22  ;;  %6613 = vpow2.f32 %v3562_v26  ;;  %v3546_v5 = vpop.xlane.xlu1 %3545 }
 0x7e5   :  { %6615 = vpow2.f32 %v3566_v33  ;;  %v3556_v58 = vsub.f32 %v7406_v37, %v3546_v5 }
 0x7e6   :  { %v7436_v15 = vpop.eup %6609  ;;  %v3572_v38 = vmul.f32 1.442695, %v3557_v28 }
 0x7e7   :  { %v3574_v2 = vsel %vm221_vm3, %v7436_v15, 0.0  ;;  %v7465_v25 = vpop.permute.xlu0 %4422 }
 0x7e8   :  { %3575 = vadd.xlane.f32.xlu1 %v3574_v2  ;;  %6617 = vpow2.f32 %v3572_v38 }
 0x7ea   :  { %v7440_v17 = vpop.eup %6611 }
 0x7eb   :  { %v3589_v18 = vsel %vm221_vm3, %v7440_v17, 0.0 }
 0x7ec   :  { %3590 = vadd.xlane.f32.xlu0 %v3589_v18 }
 0x7ee   :  { %v7453_v41 = vpop.eup %6613 }
 0x7ef   :  { %v7455_v53 = vpop.eup %6615  ;;  %v3580_v60 = vsel %vm221_vm3, %v7453_v41, 0.0 }
 0x7f0   :  { %v3586_v20 = vsel %vm221_vm3, %v7455_v53, 0.0 }
 0x7f2   :  { %v7459_v61 = vpop.eup %6617 }
 0x7f3   :  { %v3595_v23 = vsel %vm221_vm3, %v7459_v61, 0.0 }
 0x7f9   :  { %4498 = vrot.lane.b32.xlu1 %v6861_v36, %s6705_s23 }
 0x802   :  { %4420 = vrot.lane.b32.xlu0 %v6859_v35, %s6705_s23 }
 0x81d   :  { %3581 = vadd.xlane.f32.xlu1 %v3580_v60 }
 0x821   :  { %3587 = vadd.xlane.f32.xlu1 %v3586_v20  ;;  %3596 = vadd.xlane.f32.xlu0 %v3595_v23 }
 0x830   :  { %v3579_v62 = vpop.xlane.xlu0 %3578 }
 0x831   :  { %6619 = vrcp.f32 %v3579_v62 }
 0x832   :  { %4656 = vrot.lane.b32.xlu1 %v6867_v40, %s6704_s22 }
 0x834   :  { %v3585_v63 = vpop.xlane.xlu0 %3584 }
 0x835   :  { %6621 = vrcp.f32 %v3585_v63 }
 0x837   :  { %4578 = vrot.lane.b32.xlu0 %v6865_v39, %s6704_s22 }
 0x83b   :  { %v6620_v0 = vpop.eup %6619  ;;  %4576 = vrot.lane.b32.xlu0 %v6865_v39, %s6705_s23 }
 0x83c   :  { %v3607_v1 = vmul.f32 %v6620_v0, %v6606_v3  ;;  %v3570_v3 = vmul.f32 1.442695, %v3556_v58 }
 0x83e   :  { %6343 = vmatmul.mubr.msk.f32.vlgmr.msra.gmra.mrb[40].mxu0 %vm221_vm3, %v3607_v1  ;;  %6623 = vpow2.f32 %v3570_v3 }
 0x83f   :  { %v6622_v8 = vpop.eup %6621  ;;  %6351 = vmatpush3.msra.mxu0 %v7416_v45  ;;  %4734 = vrot.lane.b32.xlu0 %v6871_v43, %s6704_s22 }
 0x840   :  { %v3609_v10 = vmul.f32 %v6622_v8, %v6608_v6  ;;  %6352 = vmatprep.mubr.msk.f32.mxu0 %vm6695_vm2, %v6694_v27  ;;  %6360 = vmatprep.subr.mxu0 %v6694_v27 }
 0x842   :  { %6353 = vmatmul.mubr.msk.f32.vlgmr.msra.gmra.mrb[42].mxu0 %vm221_vm3, %v3609_v10  ;;  %v4263_v10 = vld [vmem:[%s7798_s5] sm:$0xff]  ;;  %s6706_s5 = smov 40  }
 0x843   :  { %6361 = vmatpush3.msra.mxu0 %v7418_v46  ;;  %4732 = vrot.lane.b32.xlu0 %v6871_v43, %s6705_s23 }
 0x844   :  { %6362 = vmatprep.mubr.msk.f32.mxu0 %vm6695_vm2, %v6694_v27  ;;  %6370 = vmatprep.subr.mxu0 %v6694_v27 }
 0x848   :  { %v7488_v37 = vpop.eup %6623 }
 0x849   :  { %v3592_v45 = vsel %vm221_vm3, %v7488_v37, 0.0 }
 0x856   :  { %3593 = vadd.xlane.f32.xlu1 %v3592_v45 }
 0x867   :  { %4654 = vrot.lane.b32.xlu1 %v6867_v40, %s6705_s23 }
 0x86b   :  { %4812 = vrot.lane.b32.xlu1 %v6873_v44, %s6704_s22 }
 0x86f   :  { %4810 = vrot.lane.b32.xlu1 %v6873_v44, %s6705_s23 }
 0x875   :  { %v3576_v46 = vpop.xlane.xlu1 %3575 }
 0x876   :  { %6625 = vrcp.f32 %v3576_v46 }
 0x879   :  { %v3591_v6 = vpop.xlane.xlu0 %3590 }
 0x87a   :  { %6627 = vrcp.f32 %v3591_v6 }
 0x87d   :  { %v4421_v2 = vpop.permute.xlu0 %4420 }
 0x880   :  { %v6626_v11 = vpop.eup %6625 }
 0x881   :  { %v3606_v12 = vmul.f32 %v6626_v11, %v7436_v15  ;;  %v4499_v15 = vpop.permute.xlu1 %4498 }
 0x883   :  { %6338 = vmatmul.mubr.msk.f32.vlgmr.msra.gmra.mrb[48].mxu1 %vm221_vm3, %v3606_v12 }
 0x884   :  { %v6628_v32 = vpop.eup %6627  ;;  %6346 = vmatpush3.msra.mxu1 %v7414_v42  ;;  %6347 = vmatprep.mubr.msk.f32.mxu1 %vm6695_vm2, %v6694_v27 }
 0x885   :  { %v3611_v13 = vmul.f32 %v6628_v32, %v7440_v17  ;;  %6355 = vmatprep.subr.mxu1 %v6694_v27 }
 0x887   :  { %6363 = vmatmul.mubr.msk.f32.vlgmr.msra.gmra.mrb[44].mxu0 %vm221_vm3, %v3611_v13 }
 0x888   :  { %6371 = vmatpush3.msra.mxu0 %v7422_v48  ;;  %6372 = vmatprep.mubr.msk.f32.mxu0 %vm6695_vm2, %v6694_v27 }
 0x889   :  { %6380 = vmatprep.subr.mxu0 %v6694_v27 }
 0x8aa   :  { %v3582_v18 = vpop.xlane.xlu1 %3581 }
 0x8ab   :  { %6629 = vrcp.f32 %v3582_v18 }
 0x8ae   :  { %v3588_v42 = vpop.xlane.xlu1 %3587  ;;  %v3597_v14 = vpop.xlane.xlu0 %3596 }
 0x8af   :  { %6631 = vrcp.f32 %v3588_v42 }
 0x8b0   :  { %6633 = vrcp.f32 %v3597_v14 }
 0x8b2   :  { %v4579_v26 = vpop.permute.xlu0 %4578 }
 0x8b5   :  { %v6630_v17 = vpop.eup %6629 }
 0x8b6   :  { %v3608_v19 = vmul.f32 %v6630_v17, %v7453_v41  ;;  %v4577_v38 = vpop.permute.xlu0 %4576 }
 0x8b8   :  { %6348 = vmatmul.mubr.msk.f32.vlgmr.msra.gmra.mrb[50].mxu1 %vm221_vm3, %v3608_v19 }
 0x8b9   :  { %v6632_v21 = vpop.eup %6631  ;;  %6356 = vmatpush3.msra.mxu1 %v7420_v47  ;;  %6357 = vmatprep.mubr.msk.f32.mxu1 %vm6695_vm2, %v6694_v27  ;;  %v4657_v47 = vpop.permute.xlu1 %4656 }
 0x8ba   :  { %v6634_v48 = vpop.eup %6633  ;;  %v3610_v22 = vmul.f32 %v6632_v21, %v7455_v53  ;;  %6365 = vmatprep.subr.mxu1 %v6694_v27 }
 0x8bb   :  { %v3613_v24 = vmul.f32 %v6634_v48, %v7459_v61 }
 0x8bc   :  { %6358 = vmatmul.mubr.msk.f32.vlgmr.msra.gmra.mrb[52].mxu1 %vm221_vm3, %v3610_v22 }
 0x8bd   :  { %6366 = vmatpush3.msra.mxu1 %v7424_v49  ;;  %6373 = vmatmul.mubr.msk.f32.vlgmr.msra.gmra.mrb[46].mxu0 %vm221_vm3, %v3613_v24 }
 0x8be   :  { %6381 = vmatpush3.xpose.msk.msra.mxu0 %vm221_vm3, %v7426_v51  ;;  %6382 = vmatprep.mubr.msk.f32.mxu0 %vm6695_vm2, %v6694_v27 }
 0x8bf   :  { %6390 = vmatprep.subr.mxu0 %v6694_v27  ;;  %6367 = vmatprep.mubr.msk.f32.mxu1 %vm6695_vm2, %v6694_v27 }
 0x8c0   :  { %6375 = vmatprep.subr.mxu1 %v6694_v27 }
 0x8c1   :  { %6383 = vmatmul.mubr.msk.f32.vlgmr.msra.gmra.mrb[48].mxu0 %vm221_vm3, %v7430_v55 }
 0x8c2   :  { %6391 = vmatpush3.xpose.msk.msra.mxu0 %vm221_vm3, %v7448_v16  ;;  %6392 = vmatprep.mubr.msk.f32.mxu0 %vm6695_vm2, %v6694_v27 }
 0x8c3   :  { %6400 = vmatprep.subr.mxu0 %v6694_v27 }
 0x8c5   :  { %6393 = vmatmul.mubr.msk.f32.vlgmr.msra.gmra.mrb[50].mxu0 %vm221_vm3, %v4499_v15 }
 0x8c6   :  { %6401 = vmatpush3.xpose.msk.msra.mxu0 %vm221_vm3, %v4657_v47  ;;  %6402 = vmatprep.mubr.msk.f32.mxu0 %vm6695_vm2, %v6694_v27 }
 0x8c7   :  { %6410 = vmatprep.subr.mxu0 %v6694_v27 }
 0x8e3   :  { %v3594_v49 = vpop.xlane.xlu1 %3593 }
 0x8e4   :  { %6635 = vrcp.f32 %v3594_v49 }
 0x8e7   :  { %v4655_v51 = vpop.permute.xlu1 %4654 }
 0x8e8   :  { %6403 = vmatmul.mubr.msk.f32.vlgmr.msra.gmra.mrb[52].mxu0 %vm221_vm3, %v4655_v51 }
 0x8e9   :  { %6412 = vmatprep.mubr.msk.f32.mxu0 %vm6695_vm2, %v6694_v27 }
 0x8eb   :  { %v4813_v55 = vpop.permute.xlu1 %4812 }
 0x8ec   :  { %6411 = vmatpush3.xpose.msk.msra.mxu0 %vm221_vm3, %v4813_v55 }
 0x8ed   :  { %6420 = vmatprep.subr.mxu0 %v6694_v27 }
 0x8ee   :  { %v6636_v16 = vpop.eup %6635 }
 0x8ef   :  { %v3612_v28 = vmul.f32 %v6636_v16, %v7488_v37  ;;  %v4811_v33 = vpop.permute.xlu1 %4810 }
 0x8f0   :  { %6413 = vmatmul.mubr.msk.f32.vlgmr.msra.gmra.mrb[54].mxu0 %vm221_vm3, %v4811_v33 }
 0x8f1   :  { %6368 = vmatmul.mubr.msk.f32.vlgmr.msra.gmra.mrb[54].mxu1 %vm221_vm3, %v3612_v28  ;;  %6422 = vmatprep.mubr.msk.f32.mxu0 %vm6695_vm2, %v6694_v27 }
 0x8f2   :  { %6376 = vmatpush3.xpose.msk.msra.mxu1 %vm221_vm3, %v7428_v30  ;;  %6377 = vmatprep.mubr.msk.f32.mxu1 %vm6695_vm2, %v6694_v27  ;;  %v4735_v30 = vpop.permute.xlu0 %4734 }
 0x8f3   :  { %6385 = vmatprep.subr.mxu1 %v6694_v27 }
 0x8f5   :  { %6378 = vmatmul.mubr.msk.f32.vlgmr.msra.gmra.mrb[56].mxu1 %vm221_vm3, %v7432_v57 }
 0x8f6   :  { %6386 = vmatpush3.xpose.msk.msra.mxu1 %vm221_vm3, %v7465_v25  ;;  %6387 = vmatprep.mubr.msk.f32.mxu1 %vm6695_vm2, %v6694_v27  ;;  %v4733_v57 = vpop.permute.xlu0 %4732 }
 0x8f7   :  { %6395 = vmatprep.subr.mxu1 %v6694_v27 }
 0x8f9   :  { %6388 = vmatmul.mubr.msk.f32.vlgmr.msra.gmra.mrb[58].mxu1 %vm221_vm3, %v4421_v2 }
 0x8fa   :  { %6396 = vmatpush3.xpose.msk.msra.mxu1 %vm221_vm3, %v4579_v26  ;;  %6397 = vmatprep.mubr.msk.f32.mxu1 %vm6695_vm2, %v6694_v27 }
 0x8fb   :  { %6405 = vmatprep.subr.mxu1 %v6694_v27 }
 0x8fd   :  { %6398 = vmatmul.mubr.msk.f32.vlgmr.msra.gmra.mrb[60].mxu1 %vm221_vm3, %v4577_v38 }
 0x8fe   :  { %6406 = vmatpush3.xpose.msk.msra.mxu1 %vm221_vm3, %v4735_v30  ;;  %6407 = vmatprep.mubr.msk.f32.mxu1 %vm6695_vm2, %v6694_v27 }
 0x8ff   :  { %6415 = vmatprep.subr.mxu1 %v6694_v27 }
 0x901   :  { %6408 = vmatmul.mubr.msk.f32.vlgmr.msra.gmra.mrb[62].mxu1 %vm221_vm3, %v4733_v57 }
 0x902   :  { %6417 = vmatprep.mubr.msk.f32.mxu1 %vm6695_vm2, %v6694_v27 }
 0x911   :  { %v7576_v41 = vpop.f32.mrb[40].mxu0 }
 0x912   :  { %v6344_v53 = vpop.f32.mrb[41].mxu0 }
 0x915   :  { %v7578_v60 = vpop.f32.mrb[42].mxu0 }
 0x916   :  { %v6354_v61 = vpop.f32.mrb[43].mxu0 }
 0x956   :  { %v7580_v20 = vpop.f32.mrb[48].mxu1 }
 0x957   :  { %v6339_v23 = vpop.f32.mrb[49].mxu1 }
 0x95a   :  { %v7582_v25 = vpop.f32.mrb[44].mxu0 }
 0x95b   :  { %v6364_v62 = vpop.f32.mrb[45].mxu0 }
 0x98b   :  { %v7584_v63 = vpop.f32.mrb[50].mxu1 }
 0x98c   :  { %v6349_v0 = vpop.f32.mrb[51].mxu1 }
 0x98f   :  { %v7586_v1 = vpop.f32.mrb[52].mxu1 }
 0x990   :  { %v7588_v5 = vpop.f32.mrb[46].mxu0  ;;  %v6359_v8 = vpop.f32.mrb[53].mxu1 }
 0x991   :  { %v6374_v58 = vpop.f32.mrb[47].mxu0 }
 0x994   :  { %v4416_v3 = vpop.f32.mrb[48].mxu0 }
 0x995   :  { %v4417_v37 = vadd.f32 %v4416_v3, %v4263_v10  ;;  %v6384_v45 = vpop.f32.mrb[49].mxu0 }
 0x997   :  { %v4891_v46 = vsel %vm221_vm3, %v4417_v37, -inf }
 0x998   :  { %4892 = vmax.xlane.f32.xlu1 %v4891_v46  ;;  %v4572_v6 = vpop.f32.mrb[50].mxu0 }
 0x999   :  { %v6394_v11 = vpop.f32.mrb[51].mxu0  ;;  %v4573_v49 = vadd.f32 %v4572_v6, %v4263_v10 }
 0x99b   :  { %v4897_v28 = vsel %vm221_vm3, %v4573_v49, -inf }
 0x9bb   :  { %v4728_v12 = vpop.f32.mrb[52].mxu0 }
 0x9bc   :  { %v7594_v32 = vadd.f32 %v4728_v12, %v4263_v10  ;;  %v6404_v13 = vpop.f32.mrb[53].mxu0 }
 0x9be   :  { %v4903_v53 = vsel %vm221_vm3, %v7594_v32, -inf }
 0x9c3   :  { %v4884_v15 = vpop.f32.mrb[54].mxu0 }
 0x9c4   :  { %v7596_v2 = vadd.f32 %v4884_v15, %v4263_v10  ;;  %v7598_v18 = vpop.f32.mrb[54].mxu1  ;;  %v6414_v42 = vpop.f32.mrb[55].mxu0 }
 0x9c5   :  { %v6369_v14 = vpop.f32.mrb[55].mxu1 }
 0x9c6   :  { %v4909_v23 = vsel %vm221_vm3, %v7596_v2, -inf }
 0x9c8   :  { %v4338_v17 = vpop.f32.mrb[56].mxu1 }
 0x9c9   :  { %v4339_v19 = vadd.f32 %v4338_v17, %v4263_v10  ;;  %v6379_v21 = vpop.f32.mrb[57].mxu1 }
 0x9cb   :  { %v4888_v48 = vsel %vm221_vm3, %v4339_v19, -inf }
 0x9cc   :  { %4889 = vmax.xlane.f32.xlu0 %v4888_v48  ;;  %v4494_v22 = vpop.f32.mrb[58].mxu1 }
 0x9cd   :  { %v4495_v24 = vadd.f32 %v4494_v22, %v4263_v10  ;;  %v6389_v47 = vpop.f32.mrb[59].mxu1 }
 0x9cf   :  { %v4894_v51 = vsel %vm221_vm3, %v4495_v24, -inf }
 0x9d0   :  { %4895 = vmax.xlane.f32.xlu0 %v4894_v51  ;;  %v4650_v55 = vpop.f32.mrb[60].mxu1 }
 0x9d1   :  { %v4651_v16 = vadd.f32 %v4650_v55, %v4263_v10  ;;  %v6399_v26 = vpop.f32.mrb[61].mxu1 }
 0x9d3   :  { %v4900_v33 = vsel %vm221_vm3, %v4651_v16, -inf }
 0x9d4   :  { %4898 = vmax.xlane.f32.xlu0 %v4897_v28  ;;  %4901 = vmax.xlane.f32.xlu1 %v4900_v33  ;;  %v4806_v38 = vpop.f32.mrb[62].mxu1 }
 0x9d5   :  { %v4807_v30 = vadd.f32 %v4806_v38, %v4263_v10  ;;  %v6409_v57 = vpop.f32.mrb[63].mxu1 }
 0x9d7   :  { %v4906_v61 = vsel %vm221_vm3, %v4807_v30, -inf }
 0x9d8   :  { %4904 = vmax.xlane.f32.xlu0 %v4903_v53  ;;  %4907 = vmax.xlane.f32.xlu1 %v4906_v61 }
 0x9dc   :  { %4910 = vmax.xlane.f32.xlu0 %v4909_v23 }
 0x9e9   :  { %4976 = vrot.lane.b32.xlu1 %v6854_v31, %s6706_s5 }
 0x9ed   :  { %5128 = vrot.lane.b32.xlu1 %v6859_v35, %s6706_s5 }
 0x9f1   :  { %5204 = vrot.lane.b32.xlu1 %v6861_v36, %s6706_s5 }
 0x9f2   :  { %5052 = vrot.lane.b32.xlu0 %v6857_v34, %s6706_s5 }
 0x9f5   :  { %5356 = vrot.lane.b32.xlu1 %v6867_v40, %s6706_s5 }
 0x9f6   :  { %5280 = vrot.lane.b32.xlu0 %v6865_v39, %s6706_s5 }
 0xa25   :  { %v4893_v62 = vpop.xlane.xlu1 %4892 }
 0xa26   :  { %v4913_v0 = vsub.f32 %v4417_v37, %v4893_v62 }
 0xa28   :  { %v4922_v8 = vmul.f32 1.442695, %v4913_v0 }
 0xa2a   :  { %6637 = vpow2.f32 %v4922_v8 }
 0xa34   :  { %v7621_v31 = vpop.eup %6637 }
 0xa35   :  { %v4939_v35 = vsel %vm221_vm3, %v7621_v31, 0.0 }
 0xa36   :  { %4940 = vadd.xlane.f32.xlu0 %v4939_v35 }
 0xa59   :  { %v4890_v36 = vpop.xlane.xlu0 %4889 }
 0xa5a   :  { %v4912_v58 = vsub.f32 %v4339_v19, %v4890_v36 }
 0xa5c   :  { %v4920_v10 = vmul.f32 1.442695, %v4912_v58 }
 0xa5d   :  { %v4896_v34 = vpop.xlane.xlu0 %4895 }
 0xa5e   :  { %6639 = vpow2.f32 %v4920_v10  ;;  %v4914_v3 = vsub.f32 %v4495_v24, %v4896_v34 }
 0xa60   :  { %v4924_v40 = vmul.f32 1.442695, %v4914_v3 }
 0xa61   :  { %v4902_v45 = vpop.xlane.xlu1 %4901  ;;  %v4899_v46 = vpop.xlane.xlu0 %4898 }
 0xa62   :  { %6641 = vpow2.f32 %v4924_v40  ;;  %v4916_v39 = vsub.f32 %v4651_v16, %v4902_v45  ;;  %v4915_v37 = vsub.f32 %v4573_v49, %v4899_v46 }
 0xa64   :  { %v4928_v6 = vmul.f32 1.442695, %v4916_v39  ;;  %v4926_v11 = vmul.f32 1.442695, %v4915_v37 }
 0xa65   :  { %v4908_v12 = vpop.xlane.xlu1 %4907  ;;  %v4905_v13 = vpop.xlane.xlu0 %4904 }
 0xa66   :  { %6643 = vpow2.f32 %v4928_v6  ;;  %v4918_v15 = vsub.f32 %v4807_v30, %v4908_v12  ;;  %v4917_v42 = vsub.f32 %v7594_v32, %v4905_v13 }
 0xa67   :  { %6645 = vpow2.f32 %v4926_v11 }
 0xa68   :  { %v7626_v14 = vpop.eup %6639  ;;  %v4932_v17 = vmul.f32 1.442695, %v4918_v15  ;;  %v4930_v19 = vmul.f32 1.442695, %v4917_v42 }
 0xa69   :  { %v4977_v21 = vpop.permute.xlu1 %4976  ;;  %v4911_v48 = vpop.xlane.xlu0 %4910  ;;  %v4936_v22 = vsel %vm221_vm3, %v7626_v14, 0.0 }
 0xa6a   :  { %6647 = vpow2.f32 %v4932_v17  ;;  %v4919_v24 = vsub.f32 %v7596_v2, %v4911_v48  ;;  %6416 = vmatpush3.msra.mxu1 %v4977_v21  ;;  %4937 = vadd.xlane.f32.xlu1 %v4936_v22  ;;  %v5633_v48 = vld [vmem:[%s7796_s3] sm:$0xff]  ;;  %v5634_v22 = vld [vmem:[%s7796_s3 + $0x8] sm:$0xff] }
 0xa6b   :  { %6649 = vpow2.f32 %v4930_v19  ;;  %6425 = vmatprep.subr.mxu1 %v6694_v27 }
 0xa6c   :  { %v7632_v47 = vpop.eup %6641  ;;  %v4934_v32 = vmul.f32 1.442695, %v4919_v24  ;;  %v6511_v24 = vpack.c.bf16 %v5634_v22, %v5633_v48 }
 0xa6d   :  { %v5053_v49 = vpop.permute.xlu0 %5052  ;;  %v4942_v51 = vsel %vm221_vm3, %v7632_v47, 0.0 }
 0xa6e   :  { %6651 = vpow2.f32 %v4934_v32  ;;  %4943 = vadd.xlane.f32.xlu1 %v4942_v51  ;;  %6421 = vmatpush3.msra.mxu0 %v5053_v49  ;;  %v5635_v49 = vld [vmem:[%s7796_s3 + $0x10] sm:$0xff]  ;;  %v5636_v51 = vld [vmem:[%s7796_s3 + $0x18] sm:$0xff] }
 0xa6f   :  { %6430 = vmatprep.subr.mxu0 %v6694_v27 }
 0xa70   :  { %v7637_v55 = vpop.eup %6643 }
 0xa71   :  { %v7639_v2 = vpop.eup %6645  ;;  %v4948_v16 = vsel %vm221_vm3, %v7637_v55, 0.0 }
 0xa72   :  { %4949 = vadd.xlane.f32.xlu1 %v4948_v16  ;;  %v4945_v26 = vsel %vm221_vm3, %v7639_v2, 0.0 }
 0xa73   :  { %4946 = vadd.xlane.f32.xlu0 %v4945_v26 }
 0xa74   :  { %v7645_v28 = vpop.eup %6647 }
 0xa75   :  { %v7647_v33 = vpop.eup %6649  ;;  %v4954_v38 = vsel %vm221_vm3, %v7645_v28, 0.0 }
 0xa76   :  { %4955 = vadd.xlane.f32.xlu1 %v4954_v38  ;;  %v4951_v30 = vsel %vm221_vm3, %v7647_v33, 0.0 }
 0xa77   :  { %4952 = vadd.xlane.f32.xlu0 %v4951_v30 }
 0xa78   :  { %v7653_v57 = vpop.eup %6651 }
 0xa79   :  { %v4957_v53 = vsel %vm221_vm3, %v7653_v57, 0.0 }
 0xa7b   :  { %4958 = vadd.xlane.f32.xlu0 %v4957_v53 }
 0xa87   :  { %5508 = vrot.lane.b32.xlu1 %v6873_v44, %s6706_s5 }
 0xa8b   :  { %2870 = vrot.lane.b32.xlu1 %v7373_v50, %s6707_s27 }
 0xa8f   :  { %4232 = vrot.lane.b32.xlu1 %v7576_v41, %s6708_s28 }
 0xa91   :  { %5432 = vrot.lane.b32.xlu0 %v6871_v43, %s6706_s5  ;;  %v5281_v43 = vpop.permute.xlu0 %5280 }
 0xa93   :  { %2874 = vrot.lane.b32.xlu1 %v7377_v52, %s6707_s27 }
 0xa95   :  { %2868 = vrot.lane.b32.xlu0 %v7371_v29, %s6707_s27  ;;  %v5129_v29 = vpop.permute.xlu1 %5128 }
 0xa97   :  { %4236 = vrot.lane.b32.xlu1 %v7578_v60, %s6708_s28 }
 0xa99   :  { %4230 = vrot.lane.b32.xlu0 %v7580_v20, %s6708_s28  ;;  %v5205_v52 = vpop.permute.xlu1 %5204 }
 0xa9b   :  { %2878 = vrot.lane.b32.xlu1 %v7379_v56, %s6707_s27 }
 0xa9d   :  { %2872 = vrot.lane.b32.xlu0 %v7375_v54, %s6707_s27  ;;  %v5357_v56 = vpop.permute.xlu1 %5356 }
 0xa9f   :  { %4240 = vrot.lane.b32.xlu1 %v7582_v25, %s6708_s28 }
 0xaa1   :  { %4234 = vrot.lane.b32.xlu0 %v7584_v63, %s6708_s28 }
 0xaa3   :  { %2882 = vrot.lane.b32.xlu1 %v7381_v59, %s6707_s27 }
 0xaa5   :  { %2876 = vrot.lane.b32.xlu0 %v7390_v7, %s6707_s27 }
 0xaa7   :  { %4244 = vrot.lane.b32.xlu1 %v7588_v5, %s6708_s28 }
 0xaa9   :  { %4238 = vrot.lane.b32.xlu0 %v7586_v1, %s6708_s28 }
 0xaad   :  { %2880 = vrot.lane.b32.xlu0 %v7392_v9, %s6707_s27 }
 0xab1   :  { %4242 = vrot.lane.b32.xlu0 %v7598_v18, %s6708_s28 }
 0xac3   :  { %v4941_v44 = vpop.xlane.xlu0 %4940 }
 0xac4   :  { %6653 = vrcp.f32 %v4941_v44 }
 0xace   :  { %v6654_v50 = vpop.eup %6653 }
 0xacf   :  { %v4969_v54 = vmul.f32 %v6654_v50, %v7621_v31 }
 0xad1   :  { %6423 = vmatmul.mubr.msk.f32.vlgmr.msra.gmra.mrb[56].mxu0 %vm221_vm3, %v4969_v54 }
 0xad2   :  { %6431 = vmatpush3.msra.mxu0 %v5205_v52  ;;  %6432 = vmatprep.mubr.msk.f32.mxu0 %vm6695_vm2, %v6694_v27 }
 0xad3   :  { %6440 = vmatprep.subr.mxu0 %v6694_v27 }
 0xaf7   :  { %v4938_v59 = vpop.xlane.xlu1 %4937 }
 0xaf8   :  { %6655 = vrcp.f32 %v4938_v59 }
 0xafb   :  { %v4944_v7 = vpop.xlane.xlu1 %4943 }
 0xafc   :  { %6657 = vrcp.f32 %v4944_v7 }
 0xaff   :  { %v4950_v9 = vpop.xlane.xlu1 %4949 }
 0xb00   :  { %6659 = vrcp.f32 %v4950_v9  ;;  %v4947_v41 = vpop.xlane.xlu0 %4946 }
 0xb01   :  { %6661 = vrcp.f32 %v4947_v41 }
 0xb02   :  { %v6656_v60 = vpop.eup %6655 }
 0xb03   :  { %v4968_v20 = vmul.f32 %v6656_v60, %v7626_v14  ;;  %v4956_v25 = vpop.xlane.xlu1 %4955 }
 0xb04   :  { %6663 = vrcp.f32 %v4956_v25  ;;  %v4953_v63 = vpop.xlane.xlu0 %4952 }
 0xb05   :  { %6665 = vrcp.f32 %v4953_v63  ;;  %6418 = vmatmul.mubr.msk.f32.vlgmr.msra.gmra.mrb[64].mxu1 %vm221_vm3, %v4968_v20 }
 0xb06   :  { %v6658_v1 = vpop.eup %6657  ;;  %6426 = vmatpush3.msra.mxu1 %v5129_v29  ;;  %6427 = vmatprep.mubr.msk.f32.mxu1 %vm6695_vm2, %v6694_v27 }
 0xb07   :  { %v4970_v5 = vmul.f32 %v6658_v1, %v7632_v47  ;;  %v5509_v18 = vpop.permute.xlu1 %5508  ;;  %6435 = vmatprep.subr.mxu1 %v6694_v27 }
 0xb08   :  { %v4959_v61 = vpop.xlane.xlu0 %4958 }
 0xb09   :  { %6667 = vrcp.f32 %v4959_v61  ;;  %6428 = vmatmul.mubr.msk.f32.vlgmr.msra.gmra.mrb[66].mxu1 %vm221_vm3, %v4970_v5 }
 0xb0a   :  { %v6660_v23 = vpop.eup %6659  ;;  %6436 = vmatpush3.msra.mxu1 %v5281_v43  ;;  %6437 = vmatprep.mubr.msk.f32.mxu1 %vm6695_vm2, %v6694_v27 }
 0xb0b   :  { %v6662_v62 = vpop.eup %6661  ;;  %v4972_v0 = vmul.f32 %v6660_v23, %v7637_v55  ;;  %v2871_v8 = vpop.permute.xlu1 %2870  ;;  %6445 = vmatprep.subr.mxu1 %v6694_v27  ;;  %v6517_v55 = vpack.c.bf16 %v5636_v51, %v5635_v49 }
 0xb0c   :  { %v4971_v31 = vmul.f32 %v6662_v62, %v7639_v2  ;;  %2894 = vst.msk [vmem:[#allocation2 + $0x8] sm:$0xff] %vm2892_vm4, %v2871_v8  ;;  %v5433_v35 = vpop.permute.xlu0 %5432  ;;  %v5926_v62 = vld [vmem:[%s7797_s4] ss:$0 sm:$0xff]  ;;  %s6710_s4 = smov [#allocation3]  }
 0xb0d   :  { %6438 = vmatmul.mubr.msk.f32.vlgmr.msra.gmra.mrb[68].mxu1 %vm221_vm3, %v4972_v0  ;;  %s5798_s2 = sshll.u32 %s6710_s4, 4  ;;  %s5799_s2 = int_to_ptr.vmem [resolvable:$true] %s5798_s2 }
 0xb0e   :  { %v6664_v36 = vpop.eup %6663  ;;  %6433 = vmatmul.mubr.msk.f32.vlgmr.msra.gmra.mrb[58].mxu0 %vm221_vm3, %v4971_v31  ;;  %6446 = vmatpush3.msra.mxu1 %v5433_v35  ;;  %s6670_s14 = scalar_lea.vmem %s5799_s2, 1024  ;;  %p6675_p1 = scmp.lt.s32.totalorder %s5799_s2, %s5799_s2 }
 0xb0f   :  { %v6666_v58 = vpop.eup %6665  ;;  %v4974_v10 = vmul.f32 %v6664_v36, %v7645_v28  ;;  %6441 = vmatpush3.msra.mxu0 %v5357_v56  ;;  %v4233_v34 = vpop.permute.xlu1 %4232  ;;  %6442 = vmatprep.mubr.msk.f32.mxu0 %vm6695_vm2, %v6694_v27  ;;  %p6671_p0 = scmp.ne.s32.totalorder %s5799_s2, %s6670_s14  ;;  %p6676_p2 = scmp.lt.s32.totalorder %s6670_s14, %s6670_s14 }
 0xb10   :  { %v4973_v3 = vmul.f32 %v6666_v58, %v7647_v33  ;;  %4256 = vst.msk [vmem:[#allocation2 + $0x8] sm:$0xff] %vm4254_vm5, %v4233_v34  ;;  %v2869_v40 = vpop.permute.xlu0 %2868  ;;  %6447 = vmatprep.mubr.msk.f32.mxu1 %vm6695_vm2, %v6694_v27  ;;  %6450 = vmatprep.subr.mxu0 %v6694_v27 }
 0xb11   :  { %2893 = vst.msk [vmem:[#allocation2] sm:$0xff] %vm2892_vm4, %v2869_v40  ;;  %6448 = vmatmul.mubr.msk.f32.vlgmr.msra.gmra.mrb[70].mxu1 %vm221_vm3, %v4974_v10  ;;  %6513 = vmatprep.subr.msk.bf16.mxu1 %vm6758_vm1, %v6511_v24  ;;  %p6677_p3 = por %p6676_p2, %p6675_p1 }
 0xb12   :  { %6443 = vmatmul.mubr.msk.f32.vlgmr.msra.gmra.mrb[60].mxu0 %vm221_vm3, %v4973_v3 }
 0xb13   :  { %v6668_v45 = vpop.eup %6667  ;;  %6451 = vmatpush3.msra.mxu0 %v5509_v18  ;;  %v2875_v46 = vpop.permute.xlu1 %2874  ;;  %6452 = vmatprep.mubr.msk.f32.mxu0 %vm6695_vm2, %v6694_v27  ;;  %p6678_p4 = pnand %p6677_p3, %p6671_p0 }
 0xb14   :  { %v4975_v39 = vmul.f32 %v6668_v45, %v7653_v57  ;;  %2896 = vst.msk [vmem:[#allocation2 + $0x18] sm:$0xff] %vm2892_vm4, %v2875_v46  ;;  %v4231_v37 = vpop.permute.xlu0 %4230 }
 0xb15   :  { %4255 = vst.msk [vmem:[#allocation2] sm:$0xff] %vm4254_vm5, %v4231_v37  ;;  %6516 = vmatpush3.bf16.xpose.msk.msra.mxu1 %vm6758_vm1, %v6511_v24 }
 0xb16   :  { %6453 = vmatmul.mubr.msk.f32.vlgmr.msra.gmra.mrb[62].mxu0 %vm221_vm3, %v4975_v39  ;;  %6519 = vmatprep.subr.msk.bf16.mxu1 %vm6758_vm1, %v6517_v55 }
 0xb17   :  { %v4237_v6 = vpop.permute.xlu1 %4236 }
 0xb18   :  { %4258 = vst.msk [vmem:[#allocation2 + $0x18] sm:$0xff] %vm4254_vm5, %v4237_v6  ;;  %v2873_v11 = vpop.permute.xlu0 %2872 }
 0xb19   :  { %2895 = vst.msk [vmem:[#allocation2 + $0x10] sm:$0xff] %vm2892_vm4, %v2873_v11 }
 0xb1b   :  { %v2879_v12 = vpop.permute.xlu1 %2878 }
 0xb1c   :  { %2898 = vst.msk [vmem:[#allocation2 + $0x28] sm:$0xff] %vm2892_vm4, %v2879_v12  ;;  %v4235_v13 = vpop.permute.xlu0 %4234 }
 0xb1d   :  { %4257 = vst.msk [vmem:[#allocation2 + $0x10] sm:$0xff] %vm4254_vm5, %v4235_v13  ;;  %6522 = vmatpush3.bf16.xpose.msk.msra.mxu1 %vm6758_vm1, %v6517_v55 }
 0xb1f   :  { %v4241_v27 = vpop.permute.xlu1 %4240 }
 0xb20   :  { %4260 = vst.msk [vmem:[#allocation2 + $0x28] sm:$0xff] %vm4254_vm5, %v4241_v27  ;;  %v2877_v15 = vpop.permute.xlu0 %2876 }
 0xb21   :  { %2897 = vst.msk [vmem:[#allocation2 + $0x20] sm:$0xff] %vm2892_vm4, %v2877_v15 }
 0xb23   :  { %v2883_v42 = vpop.permute.xlu1 %2882 }
 0xb24   :  { %2900 = vst.msk [vmem:[#allocation2 + $0x38] sm:$0xff] %vm2892_vm4, %v2883_v42  ;;  %v4239_v14 = vpop.permute.xlu0 %4238 }
 0xb25   :  { %4259 = vst.msk [vmem:[#allocation2 + $0x20] sm:$0xff] %vm4254_vm5, %v4239_v14 }
 0xb27   :  { %v4245_v17 = vpop.permute.xlu1 %4244 }
 0xb28   :  { %4262 = vst.msk [vmem:[#allocation2 + $0x38] sm:$0xff] %vm4254_vm5, %v4245_v17  ;;  %v2881_v19 = vpop.permute.xlu0 %2880 }
 0xb29   :  { %2899 = vst.msk [vmem:[#allocation2 + $0x30] sm:$0xff] %vm2892_vm4, %v2881_v19 }
 0xb2c   :  { %v4243_v21 = vpop.permute.xlu0 %4242 }
 0xb2d   :  { %4261 = vst.msk [vmem:[#allocation2 + $0x30] sm:$0xff] %vm4254_vm5, %v4243_v21 }
 0xba4   :  { %v5124_v47 = vpop.f32.mrb[56].mxu0 }
 0xba5   :  { %5594 = vrot.lane.b32.xlu1 %v5124_v47, %s6709_s9  ;;  %v6424_v32 = vpop.f32.mrb[57].mxu0 }
 0xbd8   :  { %v5048_v2 = vpop.f32.mrb[64].mxu1 }
 0xbd9   :  { %v6419_v16 = vpop.f32.mrb[65].mxu1  ;;  %5592 = vrot.lane.b32.xlu0 %v5048_v2, %s6709_s9 }
 0xbdc   :  { %v5200_v26 = vpop.f32.mrb[66].mxu1 }
 0xbdd   :  { %v6429_v28 = vpop.f32.mrb[67].mxu1  ;;  %5596 = vrot.lane.b32.xlu0 %v5200_v26, %s6709_s9 }
 0xbe0   :  { %v5352_v33 = vpop.f32.mrb[68].mxu1 }
 0xbe1   :  { %v5276_v38 = vpop.f32.mrb[58].mxu0  ;;  %5600 = vrot.lane.b32.xlu0 %v5352_v33, %s6709_s9  ;;  %v6439_v30 = vpop.f32.mrb[69].mxu1 }
 0xbe2   :  { %5598 = vrot.lane.b32.xlu1 %v5276_v38, %s6709_s9  ;;  %v6434_v57 = vpop.f32.mrb[59].mxu0 }
 0xbe4   :  { %v5504_v53 = vpop.f32.mrb[70].mxu1 }
 0xbe5   :  { %v5428_v43 = vpop.f32.mrb[60].mxu0  ;;  %5604 = vrot.lane.b32.xlu0 %v5504_v53, %s6709_s9  ;;  %v6449_v44 = vpop.f32.mrb[71].mxu1 }
 0xbe6   :  { %5602 = vrot.lane.b32.xlu1 %v5428_v43, %s6709_s9  ;;  %v6444_v29 = vpop.f32.mrb[61].mxu0 }
 0xbe9   :  { %v5580_v4 = vpop.f32.mrb[62].mxu0 }
 0xbea   :  { %5606 = vrot.lane.b32.xlu1 %v5580_v4, %s6709_s9  ;;  %v6454_v50 = vpop.f32.mrb[63].mxu0 }
 0xc17   :  { %v5595_v54 = vpop.permute.xlu1 %5594 }
 0xc18   :  { %5618 = vst.msk [vmem:[#allocation2 + $0x8] sm:$0xff] %vm5616_vm6, %v5595_v54 }
 0xc1f   :  { %v5626_v41 = vld [vmem:[#allocation2 + $0x8] sm:$0xff] }
 0xc4b   :  { %v5593_v52 = vpop.permute.xlu0 %5592 }
 0xc4c   :  { %5617 = vst.msk [vmem:[#allocation2] sm:$0xff] %vm5616_vm6, %v5593_v52 }
 0xc4f   :  { %v5597_v56 = vpop.permute.xlu0 %5596 }
 0xc50   :  { %5619 = vst.msk [vmem:[#allocation2 + $0x10] sm:$0xff] %vm5616_vm6, %v5597_v56 }
 0xc53   :  { %v5601_v59 = vpop.permute.xlu0 %5600  ;;  %v5625_v7 = vld [vmem:[#allocation2] sm:$0xff] }
 0xc54   :  { %v5599_v9 = vpop.permute.xlu1 %5598  ;;  %5621 = vst.msk [vmem:[#allocation2 + $0x20] sm:$0xff] %vm5616_vm6, %v5601_v59  ;;  %6463 = vmatprep.mubr.msk.f32.mxu1 %vm51_vm0, %v5625_v7 }
 0xc55   :  { %5620 = vst.msk [vmem:[#allocation2 + $0x18] sm:$0xff] %vm5616_vm6, %v5599_v9  ;;  %6464 = vmatmul.mubr.msk.f32.vlgmr.msra.gmra.mrb[72].mxu1 %vm51_vm0, %v5626_v41 }
 0xc57   :  { %v5605_v60 = vpop.permute.xlu0 %5604  ;;  %v5627_v20 = vld [vmem:[#allocation2 + $0x10] sm:$0xff] }
 0xc58   :  { %v5603_v25 = vpop.permute.xlu1 %5602  ;;  %5623 = vst.msk [vmem:[#allocation2 + $0x30] sm:$0xff] %vm5616_vm6, %v5605_v60  ;;  %6466 = vmatprep.mubr.msk.f32.mxu1 %vm51_vm0, %v5627_v20 }
 0xc59   :  { %5622 = vst.msk [vmem:[#allocation2 + $0x28] sm:$0xff] %vm5616_vm6, %v5603_v25 }
 0xc5b   :  { %v5629_v63 = vld [vmem:[#allocation2 + $0x20] sm:$0xff] }
 0xc5c   :  { %v5607_v1 = vpop.permute.xlu1 %5606  ;;  %v5628_v5 = vld [vmem:[#allocation2 + $0x18] sm:$0xff] }
 0xc5d   :  { %5624 = vst.msk [vmem:[#allocation2 + $0x38] sm:$0xff] %vm5616_vm6, %v5607_v1  ;;  %6467 = vmatmul.mubr.msk.f32.gmra.mrb[74].mxu1 %vm51_vm0, %v5628_v5 }
 0xc5e   :  { %6469 = vmatprep.mubr.msk.f32.mxu1 %vm51_vm0, %v5629_v63 }
 0xc5f   :  { %v5631_v18 = vld [vmem:[#allocation2 + $0x30] sm:$0xff] }
 0xc60   :  { %v5630_v61 = vld [vmem:[#allocation2 + $0x28] sm:$0xff] }
 0xc61   :  { %6470 = vmatmul.mubr.msk.f32.gmra.mrb[76].mxu1 %vm51_vm0, %v5630_v61 }
 0xc62   :  { %6472 = vmatprep.mubr.msk.f32.mxu1 %vm51_vm0, %v5631_v18 }
 0xc64   :  { %v5632_v23 = vld [vmem:[#allocation2 + $0x38] sm:$0xff] }
 0xc65   :  { %6473 = vmatmul.mubr.msk.f32.gmra.mrb[78].mxu1 %vm51_vm0, %v5632_v23 }
 0xd28   :  { %v6465_v0 = vpop.f32.mrb[72].mxu1 }
 0xd29   :  { %v5752_v8 = vadd.f32 %v6465_v0, %v5926_v62  ;;  %v5746_v31 = vpop.f32.mrb[73].mxu1 }
 0xd2a   :  { %v5747_v35 = vadd.f32 %v5926_v62, %v5746_v31 }
 0xd2b   :  { %5786 = vst.msk [vmem:[#allocation3 + $0x8] sm:$0xff] %vm51_vm0, %v5752_v8 }
 0xd2c   :  { %5785 = vst.msk [vmem:[#allocation3] sm:$0xff] %vm51_vm0, %v5747_v35 }
 0xd30   :  { %v6468_v36 = vpop.f32.mrb[74].mxu1 }
 0xd31   :  { %v5762_v58 = vadd.f32 %v6468_v36, %v5926_v62  ;;  %v5756_v10 = vpop.f32.mrb[75].mxu1 }
 0xd32   :  { %v5757_v34 = vadd.f32 %v5926_v62, %v5756_v10 }
 0xd33   :  { %5788 = vst.msk [vmem:[#allocation3 + $0x18] sm:$0xff] %vm51_vm0, %v5762_v58 }
 0xd34   :  { %5787 = vst.msk [vmem:[#allocation3 + $0x10] sm:$0xff] %vm51_vm0, %v5757_v34  ;;  %v6471_v3 = vpop.f32.mrb[76].mxu1 }
 0xd35   :  { %v5772_v40 = vadd.f32 %v6471_v3, %v5926_v62  ;;  %v5766_v45 = vpop.f32.mrb[77].mxu1 }
 0xd36   :  { %v5767_v46 = vadd.f32 %v5926_v62, %v5766_v45 }
 0xd37   :  { %5790 = vst.msk [vmem:[#allocation3 + $0x28] sm:$0xff] %vm51_vm0, %v5772_v40 }
 0xd38   :  { %5789 = vst.msk [vmem:[#allocation3 + $0x20] sm:$0xff] %vm51_vm0, %v5767_v46  ;;  %v6474_v39 = vpop.f32.mrb[78].mxu1 }
 0xd39   :  { %v5782_v37 = vadd.f32 %v6474_v39, %v5926_v62  ;;  %v5776_v6 = vpop.f32.mrb[79].mxu1 }
 0xd3a   :  { %v5777_v11 = vadd.f32 %v5926_v62, %v5776_v6 }
 0xd3b   :  { %5792 = vst.msk [vmem:[#allocation3 + $0x38] sm:$0xff] %vm51_vm0, %v5782_v37 }
 0xd3c   :  { %5791 = vst.msk [vmem:[#allocation3 + $0x30] sm:$0xff] %vm51_vm0, %v5777_v11 }
 0xd3d   :  { %6681 = shalt.err (!%p6678_p4)
}
 0xd3e   :  { %s6682_s17 = scalar_lea.hbm %s7799_s6, 1024 }
 0xd3f   :  { %p6683_p5 = scmp.ne.s32.totalorder %s7799_s6, %s6682_s17  ;;  %p6686_p6 = scmp.lt.u32.totalorder %s6682_s17, %s7799_s6 }
 0xd41   :  { %p6688_p7 = pnand %p6686_p6, %p6683_p5 }
 0xd43   :  { %6691 = shalt.err (!%p6688_p7)
}
 0xd44   :  { %s6711_s22 = smov 128  }
 0xd45   :  { %5804 = dma.vmem_to_hbm [thread:$0]  %s5799_s2, 1024, %s7799_s6, [#allocation4], %s6711_s22, %s6711_s22, %s6707_s27  }
 0xd46   :  { %6692 = dma.done.wait [#allocation4], 1024  }
 0xd47   :  { %6693 = vsyncadd [#allocation4], 4294966272 }
 0xd48   :  { %5808 = vsyncpa [#allocation4], 1 }

</bundles_post_ra>
